<compile_context>
chip_gen: v7x
topology: tpu7x:2x2x1
jax: 0.10.0
libtpu: 0.0.40
codegen_flags: <defaults>
</compile_context>

<pallas_src>
import functools

import jax
import jax.numpy as jnp
from jax.experimental import pallas as pl
from jax.experimental.pallas import tpu as pltpu

KSIZE = 5
DILATIONS = (2, 5, 8, 11)
BN_EPS = 1e-5


def _ms_tcn_kernel(p_ref, x_ref, o_ref, scr_ref, *,
                   n, t, lead, tail, cb, dilations, ksize, cn, compute_dtype):
  """One (batch, channel-block): 4 dilated depthwise convs + BN + ReLU + avg + residual.

  p_ref:   (C*nb*(K+1),) SMEM -- folded conv*BN weights (k<K) and bias (k==K),
           flattened per channel; read as scalars (no vreg splats pinned
           across the chunk loop).
  x_ref:   (1, cb, n, t) VMEM -- this channel block of the f32 input.
  o_ref:   (1, cb, n, t) VMEM -- output block.
  scr_ref: (lead + n + tail, t) VMEM -- zero-halo working slab in compute
           dtype, reused by every channel of the block and all 4 dilations.
  """
  nb = len(dilations)
  k_half = ksize // 2
  pstride = nb * (ksize + 1)
  cdt = compute_dtype
  is_f32 = jnp.dtype(cdt) == jnp.dtype(jnp.float32)

  # Zero the halos once per grid step (channels below only rewrite the
  # interior rows, so the halos stay zero). Cheap: (lead+tail) rows total.
  scr_ref[pl.ds(0, lead), :] = jnp.zeros((lead, t), cdt)
  scr_ref[pl.ds(lead + n, tail), :] = jnp.zeros((tail, t), cdt)

  c_base = pl.program_id(1) * cb
  inv_nb = jnp.float32(1.0 / nb)
  n_full = n // cn

  def one_channel(c):
    # Halo-padded working copy of this channel (one VMEM->VMEM pass, shared by
    # all 4 dilations; on the bf16 path it also performs the f32->bf16 cast
    # exactly once per element instead of once per tap).
    # TODO(synk): v5e fast path -- read interior-chunk taps straight from
    # x_ref and keep only small boundary scratches, removing this copy.
    scr_ref[pl.ds(lead, n), :] = x_ref[0, c, :, :].astype(cdt)

    # Per-channel folded weights / biases as SMEM scalars, hoisted out of the
    # chunk loop (loaded once per channel, reused by every chunk).
    p0 = (c_base + c) * pstride
    w = [[p_ref[p0 + br * (ksize + 1) + k].astype(cdt) for k in range(ksize)]
         for br in range(nb)]
    bias = [p_ref[p0 + br * (ksize + 1) + ksize].astype(cdt) for br in range(nb)]

    # TODO(synk): v7x / long-T MXU path (per-channel banded matrix x scratch
    # as jnp.dot with preferred_element_type=f32) is not implemented.
    def do_chunk(n0):
      base = lead + n0
      # Shared center tap (offset 0 for every dilation); doubles as the
      # residual on the f32 path.  On the bf16 path the residual is taken
      # from the original f32 input so the residual add stays exact.
      center = scr_ref[pl.ds(base, cn), :]                     # (cn, t) cdt
      residual = center if is_f32 else x_ref[0, c, pl.ds(n0, cn), :]
      acc = None
      for br, d in enumerate(dilations):
        conv = w[br][k_half] * center                          # skip zeros-init add
        for k in range(ksize):
          if k == k_half:
            continue
          # PyTorch dilated conv (stride 1, pad 2d): out[i] = sum_k w[k]*x[i+(k-2)*d]
          tap = scr_ref[pl.ds(base + (k - k_half) * d, cn), :]
          conv = conv + w[br][k] * tap
        # Folded bias + eval-mode BN, ReLU in compute dtype; promote to f32
        # for the cross-branch accumulate / average / residual.
        r = jnp.maximum(conv + bias[br], 0.0).astype(jnp.float32)
        acc = r if acc is None else acc + r
      out = acc * inv_nb + residual.astype(jnp.float32)        # branch avg + residual
      o_ref[0, c, pl.ds(n0, cn), :] = out.astype(o_ref.dtype)  # one store per chunk

    if n_full <= 8:
      # Fully static chunk offsets (also keeps packed-dtype slices static on
      # the bf16 path).
      for ic in range(n_full):
        do_chunk(ic * cn)
    else:
      def chunk_body(ic, carry):
        do_chunk(pl.multiple_of(ic * cn, cn))   # alignment hint survives
        return carry
      jax.lax.fori_loop(0, n_full, chunk_body, 0, unroll=2)

    if n % cn:
      # Static-offset epilogue for the ragged tail; the overlapping rows are
      # recomputed identically (idempotent double-store).
      do_chunk(n - cn)

  for c in range(cb):
    one_channel(c)


def ms_tcn_long_forward(x_nchw, eff_w, eff_b, dilations=DILATIONS, ksize=KSIZE,
                        chunk_rows=32, compute_dtype=jnp.float32,
                        max_channels_per_block=16,
                        target_block_bytes=1 << 20):
  """MS-TCN "long" block forward (inference) as a Pallas TPU kernel.

  x_nchw: (B, C, N, T) float32 (PyTorch NCHW layout; no wrapper transposes/pads).
  eff_w:  (nb, K, C) conv weights with eval-mode BatchNorm scale folded in.
  eff_b:  (nb, C)    folded conv-bias + BatchNorm shift.

  Perf preconditions (not enforced): T a multiple of 128 for lane-dense
  vregs / unmasked stores; compute_dtype=jnp.bfloat16 targets the bf16 VPU on
  v6e/v7x (keep the f32 default on v5e).
  """
  B, C, N, T = x_nchw.shape
  nb = len(dilations)
  max_pad = (ksize // 2) * max(dilations)
  lead = ((max_pad + 7) // 8) * 8              # 8-aligned leading halo
  tail = max_pad
  cn = max(1, min(chunk_rows, N))              # conv chunk height (sweep 16/32/64)

  # Channel blocking: amortize per-grid-step fixed cost and produce large
  # contiguous DMAs when N*T is small.  cb = largest divisor of C whose
  # (1, cb, N, T) block stays under target_block_bytes.
  per_chan_bytes = N * T * 4
  cb = 1
  for cand in range(1, min(C, max_channels_per_block) + 1):
    if C % cand == 0 and cand * per_chan_bytes <= target_block_bytes:
      cb = cand

  x = x_nchw.astype(jnp.float32)
  # Flattened per-channel parameter table (SMEM scalars):
  #   p[c*nb*(K+1) + br*(K+1) + k] = eff_w[br, k, c]   (k < K)
  #   p[c*nb*(K+1) + br*(K+1) + K] = eff_b[br, c]
  params = jnp.concatenate(
      [jnp.transpose(eff_w, (2, 0, 1)),
       jnp.transpose(eff_b, (1, 0))[:, :, None]],
      axis=-1).astype(jnp.float32).reshape(-1)     # (C*nb*(K+1),) 1D -> no SMEM pad blowup

  cdt = jnp.dtype(compute_dtype)
  kernel = functools.partial(
      _ms_tcn_kernel, n=N, t=T, lead=lead, tail=tail, cb=cb,
      dilations=tuple(dilations), ksize=ksize, cn=cn, compute_dtype=cdt)

  # VMEM sizing: raise the scoped limit only if the double-buffered blocks +
  # scratch exceed the most conservative default (and cap at v7x's 64 MiB).
  scr_bytes = (lead + N + tail) * T * cdt.itemsize
  est_vmem = 4 * cb * per_chan_bytes + scr_bytes   # 2x(in+out) double-buffered + scratch
  vmem_limit = None
  if est_vmem > 12 * 1024 * 1024:
    vmem_limit = min(int(est_vmem * 1.5), 64 * 1024 * 1024)

  grid_spec = pltpu.PrefetchScalarGridSpec(
      num_scalar_prefetch=0,
      grid=(B, C // cb),
      in_specs=[
          pl.BlockSpec(memory_space=pltpu.MemorySpace.SMEM),   # scalar params
          pl.BlockSpec((1, cb, N, T), lambda b, cblk: (b, cblk, 0, 0)),
      ],
      out_specs=pl.BlockSpec((1, cb, N, T), lambda b, cblk: (b, cblk, 0, 0)),
      scratch_shapes=[pltpu.VMEM((lead + N + tail, T), cdt)],
  )

  # Both grid axes "parallel" so v7x can shard (B, C//cb) across its 2 TCs;
  # keep B*(C//cb) >= 2 (and ideally even) for core balance.
  return pl.pallas_call(
      kernel,
      out_shape=jax.ShapeDtypeStruct((B, C, N, T), jnp.float32),
      grid_spec=grid_spec,
      compiler_params=pltpu.CompilerParams(
          dimension_semantics=("parallel", "parallel"),
          vmem_limit_bytes=vmem_limit),
  )(params, x)


def reference_forward(x, conv_w, conv_b, gamma, beta, mean, var,
                      dilations=DILATIONS):
  """Pure-JAX NCHW reference matching the PyTorch module (eval mode)."""
  outs = []
  C = x.shape[1]
  for i, d in enumerate(dilations):
    kern = conv_w[i][:, None, :, None]              # (C, 1, K, 1) OIHW depthwise
    pad = (KSIZE // 2) * d
    y = jax.lax.conv_general_dilated(
        x, kern, window_strides=(1, 1),
        padding=((pad, pad), (0, 0)),
        rhs_dilation=(d, 1),
        dimension_numbers=("NCHW", "OIHW", "NCHW"),
        feature_group_count=C)
    y = y + conv_b[i][None, :, None, None]
    inv = (1.0 / jnp.sqrt(var[i] + BN_EPS))[None, :, None, None]
    y = gamma[i][None, :, None, None] * (y - mean[i][None, :, None, None]) * inv \
        + beta[i][None, :, None, None]
    y = jnp.maximum(y, 0.0)
    outs.append(y)
  out = sum(outs) / len(outs)
  # Inference semantics: dropout is identity, BatchNorm uses running stats.
  return out + x


if __name__ == "__main__":
  B, C, N, T = 2, 4, 16, 16
  nb = len(DILATIONS)

  key = jax.random.PRNGKey(0)
  ks = jax.random.split(key, 7)
  x = jax.random.normal(ks[0], (B, C, N, T), jnp.float32)

  # Deterministic synthetic parameters (shapes from the module's __init__):
  conv_w = 0.3 * jax.random.normal(ks[1], (nb, C, KSIZE), jnp.float32)
  conv_b = 0.1 * jax.random.normal(ks[2], (nb, C), jnp.float32)
  gamma = 1.0 + 0.2 * jax.random.normal(ks[3], (nb, C), jnp.float32)
  beta = 0.1 * jax.random.normal(ks[4], (nb, C), jnp.float32)
  run_mean = 0.1 * jax.random.normal(ks[5], (nb, C), jnp.float32)
  run_var = 0.5 + jax.random.uniform(ks[6], (nb, C), jnp.float32)

  # Fold conv bias + eval-mode BatchNorm into per-channel scale/shift:
  #   BN(conv(x)) = a * (sum_k w_k x_k + b_conv - mean) + beta
  a = gamma / jnp.sqrt(run_var + BN_EPS)                     # (nb, C)
  eff_w = jnp.transpose(conv_w * a[:, :, None], (0, 2, 1))   # (nb, K, C)
  eff_b = a * (conv_b - run_mean) + beta                     # (nb, C)

  ref = reference_forward(x, conv_w, conv_b, gamma, beta, run_mean, run_var)

  # f32 path (default; v5e-safe), tight tolerance.
  out = jax.jit(ms_tcn_long_forward)(x, eff_w, eff_b)
  out = jax.block_until_ready(out)
  err = float(jnp.max(jnp.abs(out - ref)))
  assert jnp.allclose(out, ref, atol=1e-4, rtol=1e-4), f"f32 max abs err {err}"

  # bf16 VPU fast path (targets v6e/v7x): tap MAC chain + ReLU in bf16,
  # cross-branch accumulate / average / residual kept in f32.
  out_bf16 = jax.jit(functools.partial(ms_tcn_long_forward,
                                       compute_dtype=jnp.bfloat16))(x, eff_w, eff_b)
  out_bf16 = jax.block_until_ready(out_bf16)
  err_bf16 = float(jnp.max(jnp.abs(out_bf16 - ref)))
  assert jnp.allclose(out_bf16, ref, atol=1e-1, rtol=1e-1), \
      f"bf16 max abs err {err_bf16}"

  print("KERNEL_OK")
</pallas_src>

<mosaic_0001>
module attributes {stable_mosaic.version = 11 : i64} {
  func.func @_ms_tcn_kernel(%arg0: i32, %arg1: i32, %arg2: memref<96xf32, #tpu.memory_space<smem>>, %arg3: memref<1x4x16x16xf32, #tpu.memory_space<vmem>>, %arg4: memref<1x4x16x16xf32, #tpu.memory_space<vmem>>, %arg5: memref<62x16xf32, #tpu.memory_space<vmem>>) attributes {dimension_semantics = [#tpu.dimension_semantics<parallel>, #tpu.dimension_semantics<parallel>], iteration_bounds = array<i64: 2, 1>, scalar_prefetch = 0 : i64, scratch_operands = 1 : i64, tpu.core_type = #tpu.core_type<tc>, window_params = [{transform_indices = @transform_0, window_bounds = array<i64: 96>}, {transform_indices = @transform_1, window_bounds = array<i64: 1, 4, 16, 16>}, {transform_indices = @transform_2, window_bounds = array<i64: 1, 4, 16, 16>}]} {
    %cst = arith.constant 0.000000e+00 : f32
    %0 = vector.broadcast %cst : f32 to vector<24x16xf32>
    %c0 = arith.constant 0 : index
    %c0_0 = arith.constant 0 : index
    %1 = vector.load %arg5[%c0, %c0_0] : memref<62x16xf32, #tpu.memory_space<vmem>>, vector<24x16xf32>
    tpu.vector_store %arg5[%c0, %c0_0], %0 {strides = array<i32>} : memref<62x16xf32, #tpu.memory_space<vmem>>, vector<24x16xf32>,
    %cst_1 = arith.constant 0.000000e+00 : f32
    %2 = vector.broadcast %cst_1 : f32 to vector<22x16xf32>
    %c40 = arith.constant 40 : index
    %c0_2 = arith.constant 0 : index
    %3 = vector.load %arg5[%c40, %c0_2] : memref<62x16xf32, #tpu.memory_space<vmem>>, vector<22x16xf32>
    tpu.vector_store %arg5[%c40, %c0_2], %2 {strides = array<i32>} : memref<62x16xf32, #tpu.memory_space<vmem>>, vector<22x16xf32>,
    %c4_i32 = arith.constant 4 : i32
    %4 = arith.muli %arg1, %c4_i32 : i32
    %c0_3 = arith.constant 0 : index
    %c0_4 = arith.constant 0 : index
    %c0_5 = arith.constant 0 : index
    %c0_6 = arith.constant 0 : index
    %5 = vector.load %arg3[%c0_3, %c0_4, %c0_5, %c0_6] : memref<1x4x16x16xf32, #tpu.memory_space<vmem>>, vector<1x1x16x16xf32>
    %6 = vector.shape_cast %5 : vector<1x1x16x16xf32> to vector<16x16xf32>
    %c24 = arith.constant 24 : index
    %c0_7 = arith.constant 0 : index
    %7 = vector.load %arg5[%c24, %c0_7] : memref<62x16xf32, #tpu.memory_space<vmem>>, vector<16x16xf32>
    tpu.vector_store %arg5[%c24, %c0_7], %6 {strides = array<i32>} : memref<62x16xf32, #tpu.memory_space<vmem>>, vector<16x16xf32>,
    %c0_i32 = arith.constant 0 : i32
    %8 = arith.addi %4, %c0_i32 : i32
    %c24_i32 = arith.constant 24 : i32
    %9 = arith.muli %8, %c24_i32 : i32
    %c0_i32_8 = arith.constant 0 : i32
    %10 = arith.addi %9, %c0_i32_8 : i32
    %c0_i32_9 = arith.constant 0 : i32
    %11 = arith.addi %10, %c0_i32_9 : i32
    %12 = arith.index_cast %11 : i32 to index
    %13 = memref.load %arg2[%12] : memref<96xf32, #tpu.memory_space<smem>>
    %c0_i32_10 = arith.constant 0 : i32
    %14 = arith.addi %9, %c0_i32_10 : i32
    %c1_i32 = arith.constant 1 : i32
    %15 = arith.addi %14, %c1_i32 : i32
    %16 = arith.index_cast %15 : i32 to index
    %17 = memref.load %arg2[%16] : memref<96xf32, #tpu.memory_space<smem>>
    %c0_i32_11 = arith.constant 0 : i32
    %18 = arith.addi %9, %c0_i32_11 : i32
    %c2_i32 = arith.constant 2 : i32
    %19 = arith.addi %18, %c2_i32 : i32
    %20 = arith.index_cast %19 : i32 to index
    %21 = memref.load %arg2[%20] : memref<96xf32, #tpu.memory_space<smem>>
    %c0_i32_12 = arith.constant 0 : i32
    %22 = arith.addi %9, %c0_i32_12 : i32
    %c3_i32 = arith.constant 3 : i32
    %23 = arith.addi %22, %c3_i32 : i32
    %24 = arith.index_cast %23 : i32 to index
    %25 = memref.load %arg2[%24] : memref<96xf32, #tpu.memory_space<smem>>
    %c0_i32_13 = arith.constant 0 : i32
    %26 = arith.addi %9, %c0_i32_13 : i32
    %c4_i32_14 = arith.constant 4 : i32
    %27 = arith.addi %26, %c4_i32_14 : i32
    %28 = arith.index_cast %27 : i32 to index
    %29 = memref.load %arg2[%28] : memref<96xf32, #tpu.memory_space<smem>>
    %c6_i32 = arith.constant 6 : i32
    %30 = arith.addi %9, %c6_i32 : i32
    %c0_i32_15 = arith.constant 0 : i32
    %31 = arith.addi %30, %c0_i32_15 : i32
    %32 = arith.index_cast %31 : i32 to index
    %33 = memref.load %arg2[%32] : memref<96xf32, #tpu.memory_space<smem>>
    %c6_i32_16 = arith.constant 6 : i32
    %34 = arith.addi %9, %c6_i32_16 : i32
    %c1_i32_17 = arith.constant 1 : i32
    %35 = arith.addi %34, %c1_i32_17 : i32
    %36 = arith.index_cast %35 : i32 to index
    %37 = memref.load %arg2[%36] : memref<96xf32, #tpu.memory_space<smem>>
    %c6_i32_18 = arith.constant 6 : i32
    %38 = arith.addi %9, %c6_i32_18 : i32
    %c2_i32_19 = arith.constant 2 : i32
    %39 = arith.addi %38, %c2_i32_19 : i32
    %40 = arith.index_cast %39 : i32 to index
    %41 = memref.load %arg2[%40] : memref<96xf32, #tpu.memory_space<smem>>
    %c6_i32_20 = arith.constant 6 : i32
    %42 = arith.addi %9, %c6_i32_20 : i32
    %c3_i32_21 = arith.constant 3 : i32
    %43 = arith.addi %42, %c3_i32_21 : i32
    %44 = arith.index_cast %43 : i32 to index
    %45 = memref.load %arg2[%44] : memref<96xf32, #tpu.memory_space<smem>>
    %c6_i32_22 = arith.constant 6 : i32
    %46 = arith.addi %9, %c6_i32_22 : i32
    %c4_i32_23 = arith.constant 4 : i32
    %47 = arith.addi %46, %c4_i32_23 : i32
    %48 = arith.index_cast %47 : i32 to index
    %49 = memref.load %arg2[%48] : memref<96xf32, #tpu.memory_space<smem>>
    %c12_i32 = arith.constant 12 : i32
    %50 = arith.addi %9, %c12_i32 : i32
    %c0_i32_24 = arith.constant 0 : i32
    %51 = arith.addi %50, %c0_i32_24 : i32
    %52 = arith.index_cast %51 : i32 to index
    %53 = memref.load %arg2[%52] : memref<96xf32, #tpu.memory_space<smem>>
    %c12_i32_25 = arith.constant 12 : i32
    %54 = arith.addi %9, %c12_i32_25 : i32
    %c1_i32_26 = arith.constant 1 : i32
    %55 = arith.addi %54, %c1_i32_26 : i32
    %56 = arith.index_cast %55 : i32 to index
    %57 = memref.load %arg2[%56] : memref<96xf32, #tpu.memory_space<smem>>
    %c12_i32_27 = arith.constant 12 : i32
    %58 = arith.addi %9, %c12_i32_27 : i32
    %c2_i32_28 = arith.constant 2 : i32
    %59 = arith.addi %58, %c2_i32_28 : i32
    %60 = arith.index_cast %59 : i32 to index
    %61 = memref.load %arg2[%60] : memref<96xf32, #tpu.memory_space<smem>>
    %c12_i32_29 = arith.constant 12 : i32
    %62 = arith.addi %9, %c12_i32_29 : i32
    %c3_i32_30 = arith.constant 3 : i32
    %63 = arith.addi %62, %c3_i32_30 : i32
    %64 = arith.index_cast %63 : i32 to index
    %65 = memref.load %arg2[%64] : memref<96xf32, #tpu.memory_space<smem>>
    %c12_i32_31 = arith.constant 12 : i32
    %66 = arith.addi %9, %c12_i32_31 : i32
    %c4_i32_32 = arith.constant 4 : i32
    %67 = arith.addi %66, %c4_i32_32 : i32
    %68 = arith.index_cast %67 : i32 to index
    %69 = memref.load %arg2[%68] : memref<96xf32, #tpu.memory_space<smem>>
    %c18_i32 = arith.constant 18 : i32
    %70 = arith.addi %9, %c18_i32 : i32
    %c0_i32_33 = arith.constant 0 : i32
    %71 = arith.addi %70, %c0_i32_33 : i32
    %72 = arith.index_cast %71 : i32 to index
    %73 = memref.load %arg2[%72] : memref<96xf32, #tpu.memory_space<smem>>
    %c18_i32_34 = arith.constant 18 : i32
    %74 = arith.addi %9, %c18_i32_34 : i32
    %c1_i32_35 = arith.constant 1 : i32
    %75 = arith.addi %74, %c1_i32_35 : i32
    %76 = arith.index_cast %75 : i32 to index
    %77 = memref.load %arg2[%76] : memref<96xf32, #tpu.memory_space<smem>>
    %c18_i32_36 = arith.constant 18 : i32
    %78 = arith.addi %9, %c18_i32_36 : i32
    %c2_i32_37 = arith.constant 2 : i32
    %79 = arith.addi %78, %c2_i32_37 : i32
    %80 = arith.index_cast %79 : i32 to index
    %81 = memref.load %arg2[%80] : memref<96xf32, #tpu.memory_space<smem>>
    %c18_i32_38 = arith.constant 18 : i32
    %82 = arith.addi %9, %c18_i32_38 : i32
    %c3_i32_39 = arith.constant 3 : i32
    %83 = arith.addi %82, %c3_i32_39 : i32
    %84 = arith.index_cast %83 : i32 to index
    %85 = memref.load %arg2[%84] : memref<96xf32, #tpu.memory_space<smem>>
    %c18_i32_40 = arith.constant 18 : i32
    %86 = arith.addi %9, %c18_i32_40 : i32
    %c4_i32_41 = arith.constant 4 : i32
    %87 = arith.addi %86, %c4_i32_41 : i32
    %88 = arith.index_cast %87 : i32 to index
    %89 = memref.load %arg2[%88] : memref<96xf32, #tpu.memory_space<smem>>
    %c0_i32_42 = arith.constant 0 : i32
    %90 = arith.addi %9, %c0_i32_42 : i32
    %c5_i32 = arith.constant 5 : i32
    %91 = arith.addi %90, %c5_i32 : i32
    %92 = arith.index_cast %91 : i32 to index
    %93 = memref.load %arg2[%92] : memref<96xf32, #tpu.memory_space<smem>>
    %c6_i32_43 = arith.constant 6 : i32
    %94 = arith.addi %9, %c6_i32_43 : i32
    %c5_i32_44 = arith.constant 5 : i32
    %95 = arith.addi %94, %c5_i32_44 : i32
    %96 = arith.index_cast %95 : i32 to index
    %97 = memref.load %arg2[%96] : memref<96xf32, #tpu.memory_space<smem>>
    %c12_i32_45 = arith.constant 12 : i32
    %98 = arith.addi %9, %c12_i32_45 : i32
    %c5_i32_46 = arith.constant 5 : i32
    %99 = arith.addi %98, %c5_i32_46 : i32
    %100 = arith.index_cast %99 : i32 to index
    %101 = memref.load %arg2[%100] : memref<96xf32, #tpu.memory_space<smem>>
    %c18_i32_47 = arith.constant 18 : i32
    %102 = arith.addi %9, %c18_i32_47 : i32
    %c5_i32_48 = arith.constant 5 : i32
    %103 = arith.addi %102, %c5_i32_48 : i32
    %104 = arith.index_cast %103 : i32 to index
    %105 = memref.load %arg2[%104] : memref<96xf32, #tpu.memory_space<smem>>
    %c24_49 = arith.constant 24 : index
    %c0_50 = arith.constant 0 : index
    %106 = vector.load %arg5[%c24_49, %c0_50] : memref<62x16xf32, #tpu.memory_space<vmem>>, vector<16x16xf32>
    %107 = vector.broadcast %21 : f32 to vector<16x16xf32>
    %108 = arith.mulf %107, %106 : vector<16x16xf32>
    %c20 = arith.constant 20 : index
    %c0_51 = arith.constant 0 : index
    %109 = vector.load %arg5[%c20, %c0_51] : memref<62x16xf32, #tpu.memory_space<vmem>>, vector<16x16xf32>
    %110 = vector.broadcast %13 : f32 to vector<16x16xf32>
    %111 = arith.mulf %110, %109 : vector<16x16xf32>
    %112 = arith.addf %108, %111 : vector<16x16xf32>
    %c22 = arith.constant 22 : index
    %c0_52 = arith.constant 0 : index
    %113 = vector.load %arg5[%c22, %c0_52] : memref<62x16xf32, #tpu.memory_space<vmem>>, vector<16x16xf32>
    %114 = vector.broadcast %17 : f32 to vector<16x16xf32>
    %115 = arith.mulf %114, %113 : vector<16x16xf32>
    %116 = arith.addf %112, %115 : vector<16x16xf32>
    %c26 = arith.constant 26 : index
    %c0_53 = arith.constant 0 : index
    %117 = vector.load %arg5[%c26, %c0_53] : memref<62x16xf32, #tpu.memory_space<vmem>>, vector<16x16xf32>
    %118 = vector.broadcast %25 : f32 to vector<16x16xf32>
    %119 = arith.mulf %118, %117 : vector<16x16xf32>
    %120 = arith.addf %116, %119 : vector<16x16xf32>
    %c28 = arith.constant 28 : index
    %c0_54 = arith.constant 0 : index
    %121 = vector.load %arg5[%c28, %c0_54] : memref<62x16xf32, #tpu.memory_space<vmem>>, vector<16x16xf32>
    %122 = vector.broadcast %29 : f32 to vector<16x16xf32>
    %123 = arith.mulf %122, %121 : vector<16x16xf32>
    %124 = arith.addf %120, %123 : vector<16x16xf32>
    %125 = vector.broadcast %93 : f32 to vector<16x16xf32>
    %126 = arith.addf %124, %125 : vector<16x16xf32>
    %cst_55 = arith.constant 0.000000e+00 : f32
    %127 = vector.broadcast %cst_55 : f32 to vector<16x16xf32>
    %128 = arith.maximumf %126, %127 : vector<16x16xf32>
    %129 = vector.broadcast %41 : f32 to vector<16x16xf32>
    %130 = arith.mulf %129, %106 : vector<16x16xf32>
    %c14 = arith.constant 14 : index
    %c0_56 = arith.constant 0 : index
    %131 = vector.load %arg5[%c14, %c0_56] : memref<62x16xf32, #tpu.memory_space<vmem>>, vector<16x16xf32>
    %132 = vector.broadcast %33 : f32 to vector<16x16xf32>
    %133 = arith.mulf %132, %131 : vector<16x16xf32>
    %134 = arith.addf %130, %133 : vector<16x16xf32>
    %c19 = arith.constant 19 : index
    %c0_57 = arith.constant 0 : index
    %135 = vector.load %arg5[%c19, %c0_57] : memref<62x16xf32, #tpu.memory_space<vmem>>, vector<16x16xf32>
    %136 = vector.broadcast %37 : f32 to vector<16x16xf32>
    %137 = arith.mulf %136, %135 : vector<16x16xf32>
    %138 = arith.addf %134, %137 : vector<16x16xf32>
    %c29 = arith.constant 29 : index
    %c0_58 = arith.constant 0 : index
    %139 = vector.load %arg5[%c29, %c0_58] : memref<62x16xf32, #tpu.memory_space<vmem>>, vector<16x16xf32>
    %140 = vector.broadcast %45 : f32 to vector<16x16xf32>
    %141 = arith.mulf %140, %139 : vector<16x16xf32>
    %142 = arith.addf %138, %141 : vector<16x16xf32>
    %c34 = arith.constant 34 : index
    %c0_59 = arith.constant 0 : index
    %143 = vector.load %arg5[%c34, %c0_59] : memref<62x16xf32, #tpu.memory_space<vmem>>, vector<16x16xf32>
    %144 = vector.broadcast %49 : f32 to vector<16x16xf32>
    %145 = arith.mulf %144, %143 : vector<16x16xf32>
    %146 = arith.addf %142, %145 : vector<16x16xf32>
    %147 = vector.broadcast %97 : f32 to vector<16x16xf32>
    %148 = arith.addf %146, %147 : vector<16x16xf32>
    %cst_60 = arith.constant 0.000000e+00 : f32
    %149 = vector.broadcast %cst_60 : f32 to vector<16x16xf32>
    %150 = arith.maximumf %148, %149 : vector<16x16xf32>
    %151 = arith.addf %128, %150 : vector<16x16xf32>
    %152 = vector.broadcast %61 : f32 to vector<16x16xf32>
    %153 = arith.mulf %152, %106 : vector<16x16xf32>
    %c8 = arith.constant 8 : index
    %c0_61 = arith.constant 0 : index
    %154 = vector.load %arg5[%c8, %c0_61] : memref<62x16xf32, #tpu.memory_space<vmem>>, vector<16x16xf32>
    %155 = vector.broadcast %53 : f32 to vector<16x16xf32>
    %156 = arith.mulf %155, %154 : vector<16x16xf32>
    %157 = arith.addf %153, %156 : vector<16x16xf32>
    %c16 = arith.constant 16 : index
    %c0_62 = arith.constant 0 : index
    %158 = vector.load %arg5[%c16, %c0_62] : memref<62x16xf32, #tpu.memory_space<vmem>>, vector<16x16xf32>
    %159 = vector.broadcast %57 : f32 to vector<16x16xf32>
    %160 = arith.mulf %159, %158 : vector<16x16xf32>
    %161 = arith.addf %157, %160 : vector<16x16xf32>
    %c32 = arith.constant 32 : index
    %c0_63 = arith.constant 0 : index
    %162 = vector.load %arg5[%c32, %c0_63] : memref<62x16xf32, #tpu.memory_space<vmem>>, vector<16x16xf32>
    %163 = vector.broadcast %65 : f32 to vector<16x16xf32>
    %164 = arith.mulf %163, %162 : vector<16x16xf32>
    %165 = arith.addf %161, %164 : vector<16x16xf32>
    %c40_64 = arith.constant 40 : index
    %c0_65 = arith.constant 0 : index
    %166 = vector.load %arg5[%c40_64, %c0_65] : memref<62x16xf32, #tpu.memory_space<vmem>>, vector<16x16xf32>
    %167 = vector.broadcast %69 : f32 to vector<16x16xf32>
    %168 = arith.mulf %167, %166 : vector<16x16xf32>
    %169 = arith.addf %165, %168 : vector<16x16xf32>
    %170 = vector.broadcast %101 : f32 to vector<16x16xf32>
    %171 = arith.addf %169, %170 : vector<16x16xf32>
    %cst_66 = arith.constant 0.000000e+00 : f32
    %172 = vector.broadcast %cst_66 : f32 to vector<16x16xf32>
    %173 = arith.maximumf %171, %172 : vector<16x16xf32>
    %174 = arith.addf %151, %173 : vector<16x16xf32>
    %175 = vector.broadcast %81 : f32 to vector<16x16xf32>
    %176 = arith.mulf %175, %106 : vector<16x16xf32>
    %c2 = arith.constant 2 : index
    %c0_67 = arith.constant 0 : index
    %177 = vector.load %arg5[%c2, %c0_67] : memref<62x16xf32, #tpu.memory_space<vmem>>, vector<16x16xf32>
    %178 = vector.broadcast %73 : f32 to vector<16x16xf32>
    %179 = arith.mulf %178, %177 : vector<16x16xf32>
    %180 = arith.addf %176, %179 : vector<16x16xf32>
    %c13 = arith.constant 13 : index
    %c0_68 = arith.constant 0 : index
    %181 = vector.load %arg5[%c13, %c0_68] : memref<62x16xf32, #tpu.memory_space<vmem>>, vector<16x16xf32>
    %182 = vector.broadcast %77 : f32 to vector<16x16xf32>
    %183 = arith.mulf %182, %181 : vector<16x16xf32>
    %184 = arith.addf %180, %183 : vector<16x16xf32>
    %c35 = arith.constant 35 : index
    %c0_69 = arith.constant 0 : index
    %185 = vector.load %arg5[%c35, %c0_69] : memref<62x16xf32, #tpu.memory_space<vmem>>, vector<16x16xf32>
    %186 = vector.broadcast %85 : f32 to vector<16x16xf32>
    %187 = arith.mulf %186, %185 : vector<16x16xf32>
    %188 = arith.addf %184, %187 : vector<16x16xf32>
    %c46 = arith.constant 46 : index
    %c0_70 = arith.constant 0 : index
    %189 = vector.load %arg5[%c46, %c0_70] : memref<62x16xf32, #tpu.memory_space<vmem>>, vector<16x16xf32>
    %190 = vector.broadcast %89 : f32 to vector<16x16xf32>
    %191 = arith.mulf %190, %189 : vector<16x16xf32>
    %192 = arith.addf %188, %191 : vector<16x16xf32>
    %193 = vector.broadcast %105 : f32 to vector<16x16xf32>
    %194 = arith.addf %192, %193 : vector<16x16xf32>
    %cst_71 = arith.constant 0.000000e+00 : f32
    %195 = vector.broadcast %cst_71 : f32 to vector<16x16xf32>
    %196 = arith.maximumf %194, %195 : vector<16x16xf32>
    %197 = arith.addf %174, %196 : vector<16x16xf32>
    %cst_72 = arith.constant 2.500000e-01 : f32
    %198 = vector.broadcast %cst_72 : f32 to vector<16x16xf32>
    %199 = arith.mulf %197, %198 : vector<16x16xf32>
    %200 = arith.addf %199, %106 : vector<16x16xf32>
    %c0_73 = arith.constant 0 : index
    %c0_74 = arith.constant 0 : index
    %c0_75 = arith.constant 0 : index
    %c0_76 = arith.constant 0 : index
    %201 = vector.load %arg4[%c0_73, %c0_74, %c0_75, %c0_76] : memref<1x4x16x16xf32, #tpu.memory_space<vmem>>, vector<1x1x16x16xf32>
    %202 = vector.shape_cast %201 : vector<1x1x16x16xf32> to vector<16x16xf32>
    %203 = vector.shape_cast %200 : vector<16x16xf32> to vector<1x1x16x16xf32>
    tpu.vector_store %arg4[%c0_73, %c0_74, %c0_75, %c0_76], %203 {strides = array<i32>} : memref<1x4x16x16xf32, #tpu.memory_space<vmem>>, vector<1x1x16x16xf32>,
    %c0_77 = arith.constant 0 : index
    %c1 = arith.constant 1 : index
    %c0_78 = arith.constant 0 : index
    %c0_79 = arith.constant 0 : index
    %204 = vector.load %arg3[%c0_77, %c1, %c0_78, %c0_79] : memref<1x4x16x16xf32, #tpu.memory_space<vmem>>, vector<1x1x16x16xf32>
    %205 = vector.shape_cast %204 : vector<1x1x16x16xf32> to vector<16x16xf32>
    %c24_80 = arith.constant 24 : index
    %c0_81 = arith.constant 0 : index
    %206 = vector.load %arg5[%c24_80, %c0_81] : memref<62x16xf32, #tpu.memory_space<vmem>>, vector<16x16xf32>
    tpu.vector_store %arg5[%c24_80, %c0_81], %205 {strides = array<i32>} : memref<62x16xf32, #tpu.memory_space<vmem>>, vector<16x16xf32>,
    %c1_i32_82 = arith.constant 1 : i32
    %207 = arith.addi %4, %c1_i32_82 : i32
    %c24_i32_83 = arith.constant 24 : i32
    %208 = arith.muli %207, %c24_i32_83 : i32
    %c0_i32_84 = arith.constant 0 : i32
    %209 = arith.addi %208, %c0_i32_84 : i32
    %c0_i32_85 = arith.constant 0 : i32
    %210 = arith.addi %209, %c0_i32_85 : i32
    %211 = arith.index_cast %210 : i32 to index
    %212 = memref.load %arg2[%211] : memref<96xf32, #tpu.memory_space<smem>>
    %c0_i32_86 = arith.constant 0 : i32
    %213 = arith.addi %208, %c0_i32_86 : i32
    %c1_i32_87 = arith.constant 1 : i32
    %214 = arith.addi %213, %c1_i32_87 : i32
    %215 = arith.index_cast %214 : i32 to index
    %216 = memref.load %arg2[%215] : memref<96xf32, #tpu.memory_space<smem>>
    %c0_i32_88 = arith.constant 0 : i32
    %217 = arith.addi %208, %c0_i32_88 : i32
    %c2_i32_89 = arith.constant 2 : i32
    %218 = arith.addi %217, %c2_i32_89 : i32
    %219 = arith.index_cast %218 : i32 to index
    %220 = memref.load %arg2[%219] : memref<96xf32, #tpu.memory_space<smem>>
    %c0_i32_90 = arith.constant 0 : i32
    %221 = arith.addi %208, %c0_i32_90 : i32
    %c3_i32_91 = arith.constant 3 : i32
    %222 = arith.addi %221, %c3_i32_91 : i32
    %223 = arith.index_cast %222 : i32 to index
    %224 = memref.load %arg2[%223] : memref<96xf32, #tpu.memory_space<smem>>
    %c0_i32_92 = arith.constant 0 : i32
    %225 = arith.addi %208, %c0_i32_92 : i32
    %c4_i32_93 = arith.constant 4 : i32
    %226 = arith.addi %225, %c4_i32_93 : i32
    %227 = arith.index_cast %226 : i32 to index
    %228 = memref.load %arg2[%227] : memref<96xf32, #tpu.memory_space<smem>>
    %c6_i32_94 = arith.constant 6 : i32
    %229 = arith.addi %208, %c6_i32_94 : i32
    %c0_i32_95 = arith.constant 0 : i32
    %230 = arith.addi %229, %c0_i32_95 : i32
    %231 = arith.index_cast %230 : i32 to index
    %232 = memref.load %arg2[%231] : memref<96xf32, #tpu.memory_space<smem>>
    %c6_i32_96 = arith.constant 6 : i32
    %233 = arith.addi %208, %c6_i32_96 : i32
    %c1_i32_97 = arith.constant 1 : i32
    %234 = arith.addi %233, %c1_i32_97 : i32
    %235 = arith.index_cast %234 : i32 to index
    %236 = memref.load %arg2[%235] : memref<96xf32, #tpu.memory_space<smem>>
    %c6_i32_98 = arith.constant 6 : i32
    %237 = arith.addi %208, %c6_i32_98 : i32
    %c2_i32_99 = arith.constant 2 : i32
    %238 = arith.addi %237, %c2_i32_99 : i32
    %239 = arith.index_cast %238 : i32 to index
    %240 = memref.load %arg2[%239] : memref<96xf32, #tpu.memory_space<smem>>
    %c6_i32_100 = arith.constant 6 : i32
    %241 = arith.addi %208, %c6_i32_100 : i32
    %c3_i32_101 = arith.constant 3 : i32
    %242 = arith.addi %241, %c3_i32_101 : i32
    %243 = arith.index_cast %242 : i32 to index
    %244 = memref.load %arg2[%243] : memref<96xf32, #tpu.memory_space<smem>>
    %c6_i32_102 = arith.constant 6 : i32
    %245 = arith.addi %208, %c6_i32_102 : i32
    %c4_i32_103 = arith.constant 4 : i32
    %246 = arith.addi %245, %c4_i32_103 : i32
    %247 = arith.index_cast %246 : i32 to index
    %248 = memref.load %arg2[%247] : memref<96xf32, #tpu.memory_space<smem>>
    %c12_i32_104 = arith.constant 12 : i32
    %249 = arith.addi %208, %c12_i32_104 : i32
    %c0_i32_105 = arith.constant 0 : i32
    %250 = arith.addi %249, %c0_i32_105 : i32
    %251 = arith.index_cast %250 : i32 to index
    %252 = memref.load %arg2[%251] : memref<96xf32, #tpu.memory_space<smem>>
    %c12_i32_106 = arith.constant 12 : i32
    %253 = arith.addi %208, %c12_i32_106 : i32
    %c1_i32_107 = arith.constant 1 : i32
    %254 = arith.addi %253, %c1_i32_107 : i32
    %255 = arith.index_cast %254 : i32 to index
    %256 = memref.load %arg2[%255] : memref<96xf32, #tpu.memory_space<smem>>
    %c12_i32_108 = arith.constant 12 : i32
    %257 = arith.addi %208, %c12_i32_108 : i32
    %c2_i32_109 = arith.constant 2 : i32
    %258 = arith.addi %257, %c2_i32_109 : i32
    %259 = arith.index_cast %258 : i32 to index
    %260 = memref.load %arg2[%259] : memref<96xf32, #tpu.memory_space<smem>>
    %c12_i32_110 = arith.constant 12 : i32
    %261 = arith.addi %208, %c12_i32_110 : i32
    %c3_i32_111 = arith.constant 3 : i32
    %262 = arith.addi %261, %c3_i32_111 : i32
    %263 = arith.index_cast %262 : i32 to index
    %264 = memref.load %arg2[%263] : memref<96xf32, #tpu.memory_space<smem>>
    %c12_i32_112 = arith.constant 12 : i32
    %265 = arith.addi %208, %c12_i32_112 : i32
    %c4_i32_113 = arith.constant 4 : i32
    %266 = arith.addi %265, %c4_i32_113 : i32
    %267 = arith.index_cast %266 : i32 to index
    %268 = memref.load %arg2[%267] : memref<96xf32, #tpu.memory_space<smem>>
    %c18_i32_114 = arith.constant 18 : i32
    %269 = arith.addi %208, %c18_i32_114 : i32
    %c0_i32_115 = arith.constant 0 : i32
    %270 = arith.addi %269, %c0_i32_115 : i32
    %271 = arith.index_cast %270 : i32 to index
    %272 = memref.load %arg2[%271] : memref<96xf32, #tpu.memory_space<smem>>
    %c18_i32_116 = arith.constant 18 : i32
    %273 = arith.addi %208, %c18_i32_116 : i32
    %c1_i32_117 = arith.constant 1 : i32
    %274 = arith.addi %273, %c1_i32_117 : i32
    %275 = arith.index_cast %274 : i32 to index
    %276 = memref.load %arg2[%275] : memref<96xf32, #tpu.memory_space<smem>>
    %c18_i32_118 = arith.constant 18 : i32
    %277 = arith.addi %208, %c18_i32_118 : i32
    %c2_i32_119 = arith.constant 2 : i32
    %278 = arith.addi %277, %c2_i32_119 : i32
    %279 = arith.index_cast %278 : i32 to index
    %280 = memref.load %arg2[%279] : memref<96xf32, #tpu.memory_space<smem>>
    %c18_i32_120 = arith.constant 18 : i32
    %281 = arith.addi %208, %c18_i32_120 : i32
    %c3_i32_121 = arith.constant 3 : i32
    %282 = arith.addi %281, %c3_i32_121 : i32
    %283 = arith.index_cast %282 : i32 to index
    %284 = memref.load %arg2[%283] : memref<96xf32, #tpu.memory_space<smem>>
    %c18_i32_122 = arith.constant 18 : i32
    %285 = arith.addi %208, %c18_i32_122 : i32
    %c4_i32_123 = arith.constant 4 : i32
    %286 = arith.addi %285, %c4_i32_123 : i32
    %287 = arith.index_cast %286 : i32 to index
    %288 = memref.load %arg2[%287] : memref<96xf32, #tpu.memory_space<smem>>
    %c0_i32_124 = arith.constant 0 : i32
    %289 = arith.addi %208, %c0_i32_124 : i32
    %c5_i32_125 = arith.constant 5 : i32
    %290 = arith.addi %289, %c5_i32_125 : i32
    %291 = arith.index_cast %290 : i32 to index
    %292 = memref.load %arg2[%291] : memref<96xf32, #tpu.memory_space<smem>>
    %c6_i32_126 = arith.constant 6 : i32
    %293 = arith.addi %208, %c6_i32_126 : i32
    %c5_i32_127 = arith.constant 5 : i32
    %294 = arith.addi %293, %c5_i32_127 : i32
    %295 = arith.index_cast %294 : i32 to index
    %296 = memref.load %arg2[%295] : memref<96xf32, #tpu.memory_space<smem>>
    %c12_i32_128 = arith.constant 12 : i32
    %297 = arith.addi %208, %c12_i32_128 : i32
    %c5_i32_129 = arith.constant 5 : i32
    %298 = arith.addi %297, %c5_i32_129 : i32
    %299 = arith.index_cast %298 : i32 to index
    %300 = memref.load %arg2[%299] : memref<96xf32, #tpu.memory_space<smem>>
    %c18_i32_130 = arith.constant 18 : i32
    %301 = arith.addi %208, %c18_i32_130 : i32
    %c5_i32_131 = arith.constant 5 : i32
    %302 = arith.addi %301, %c5_i32_131 : i32
    %303 = arith.index_cast %302 : i32 to index
    %304 = memref.load %arg2[%303] : memref<96xf32, #tpu.memory_space<smem>>
    %c24_132 = arith.constant 24 : index
    %c0_133 = arith.constant 0 : index
    %305 = vector.load %arg5[%c24_132, %c0_133] : memref<62x16xf32, #tpu.memory_space<vmem>>, vector<16x16xf32>
    %306 = vector.broadcast %220 : f32 to vector<16x16xf32>
    %307 = arith.mulf %306, %305 : vector<16x16xf32>
    %c20_134 = arith.constant 20 : index
    %c0_135 = arith.constant 0 : index
    %308 = vector.load %arg5[%c20_134, %c0_135] : memref<62x16xf32, #tpu.memory_space<vmem>>, vector<16x16xf32>
    %309 = vector.broadcast %212 : f32 to vector<16x16xf32>
    %310 = arith.mulf %309, %308 : vector<16x16xf32>
    %311 = arith.addf %307, %310 : vector<16x16xf32>
    %c22_136 = arith.constant 22 : index
    %c0_137 = arith.constant 0 : index
    %312 = vector.load %arg5[%c22_136, %c0_137] : memref<62x16xf32, #tpu.memory_space<vmem>>, vector<16x16xf32>
    %313 = vector.broadcast %216 : f32 to vector<16x16xf32>
    %314 = arith.mulf %313, %312 : vector<16x16xf32>
    %315 = arith.addf %311, %314 : vector<16x16xf32>
    %c26_138 = arith.constant 26 : index
    %c0_139 = arith.constant 0 : index
    %316 = vector.load %arg5[%c26_138, %c0_139] : memref<62x16xf32, #tpu.memory_space<vmem>>, vector<16x16xf32>
    %317 = vector.broadcast %224 : f32 to vector<16x16xf32>
    %318 = arith.mulf %317, %316 : vector<16x16xf32>
    %319 = arith.addf %315, %318 : vector<16x16xf32>
    %c28_140 = arith.constant 28 : index
    %c0_141 = arith.constant 0 : index
    %320 = vector.load %arg5[%c28_140, %c0_141] : memref<62x16xf32, #tpu.memory_space<vmem>>, vector<16x16xf32>
    %321 = vector.broadcast %228 : f32 to vector<16x16xf32>
    %322 = arith.mulf %321, %320 : vector<16x16xf32>
    %323 = arith.addf %319, %322 : vector<16x16xf32>
    %324 = vector.broadcast %292 : f32 to vector<16x16xf32>
    %325 = arith.addf %323, %324 : vector<16x16xf32>
    %cst_142 = arith.constant 0.000000e+00 : f32
    %326 = vector.broadcast %cst_142 : f32 to vector<16x16xf32>
    %327 = arith.maximumf %325, %326 : vector<16x16xf32>
    %328 = vector.broadcast %240 : f32 to vector<16x16xf32>
    %329 = arith.mulf %328, %305 : vector<16x16xf32>
    %c14_143 = arith.constant 14 : index
    %c0_144 = arith.constant 0 : index
    %330 = vector.load %arg5[%c14_143, %c0_144] : memref<62x16xf32, #tpu.memory_space<vmem>>, vector<16x16xf32>
    %331 = vector.broadcast %232 : f32 to vector<16x16xf32>
    %332 = arith.mulf %331, %330 : vector<16x16xf32>
    %333 = arith.addf %329, %332 : vector<16x16xf32>
    %c19_145 = arith.constant 19 : index
    %c0_146 = arith.constant 0 : index
    %334 = vector.load %arg5[%c19_145, %c0_146] : memref<62x16xf32, #tpu.memory_space<vmem>>, vector<16x16xf32>
    %335 = vector.broadcast %236 : f32 to vector<16x16xf32>
    %336 = arith.mulf %335, %334 : vector<16x16xf32>
    %337 = arith.addf %333, %336 : vector<16x16xf32>
    %c29_147 = arith.constant 29 : index
    %c0_148 = arith.constant 0 : index
    %338 = vector.load %arg5[%c29_147, %c0_148] : memref<62x16xf32, #tpu.memory_space<vmem>>, vector<16x16xf32>
    %339 = vector.broadcast %244 : f32 to vector<16x16xf32>
    %340 = arith.mulf %339, %338 : vector<16x16xf32>
    %341 = arith.addf %337, %340 : vector<16x16xf32>
    %c34_149 = arith.constant 34 : index
    %c0_150 = arith.constant 0 : index
    %342 = vector.load %arg5[%c34_149, %c0_150] : memref<62x16xf32, #tpu.memory_space<vmem>>, vector<16x16xf32>
    %343 = vector.broadcast %248 : f32 to vector<16x16xf32>
    %344 = arith.mulf %343, %342 : vector<16x16xf32>
    %345 = arith.addf %341, %344 : vector<16x16xf32>
    %346 = vector.broadcast %296 : f32 to vector<16x16xf32>
    %347 = arith.addf %345, %346 : vector<16x16xf32>
    %cst_151 = arith.constant 0.000000e+00 : f32
    %348 = vector.broadcast %cst_151 : f32 to vector<16x16xf32>
    %349 = arith.maximumf %347, %348 : vector<16x16xf32>
    %350 = arith.addf %327, %349 : vector<16x16xf32>
    %351 = vector.broadcast %260 : f32 to vector<16x16xf32>
    %352 = arith.mulf %351, %305 : vector<16x16xf32>
    %c8_152 = arith.constant 8 : index
    %c0_153 = arith.constant 0 : index
    %353 = vector.load %arg5[%c8_152, %c0_153] : memref<62x16xf32, #tpu.memory_space<vmem>>, vector<16x16xf32>
    %354 = vector.broadcast %252 : f32 to vector<16x16xf32>
    %355 = arith.mulf %354, %353 : vector<16x16xf32>
    %356 = arith.addf %352, %355 : vector<16x16xf32>
    %c16_154 = arith.constant 16 : index
    %c0_155 = arith.constant 0 : index
    %357 = vector.load %arg5[%c16_154, %c0_155] : memref<62x16xf32, #tpu.memory_space<vmem>>, vector<16x16xf32>
    %358 = vector.broadcast %256 : f32 to vector<16x16xf32>
    %359 = arith.mulf %358, %357 : vector<16x16xf32>
    %360 = arith.addf %356, %359 : vector<16x16xf32>
    %c32_156 = arith.constant 32 : index
    %c0_157 = arith.constant 0 : index
    %361 = vector.load %arg5[%c32_156, %c0_157] : memref<62x16xf32, #tpu.memory_space<vmem>>, vector<16x16xf32>
    %362 = vector.broadcast %264 : f32 to vector<16x16xf32>
    %363 = arith.mulf %362, %361 : vector<16x16xf32>
    %364 = arith.addf %360, %363 : vector<16x16xf32>
    %c40_158 = arith.constant 40 : index
    %c0_159 = arith.constant 0 : index
    %365 = vector.load %arg5[%c40_158, %c0_159] : memref<62x16xf32, #tpu.memory_space<vmem>>, vector<16x16xf32>
    %366 = vector.broadcast %268 : f32 to vector<16x16xf32>
    %367 = arith.mulf %366, %365 : vector<16x16xf32>
    %368 = arith.addf %364, %367 : vector<16x16xf32>
    %369 = vector.broadcast %300 : f32 to vector<16x16xf32>
    %370 = arith.addf %368, %369 : vector<16x16xf32>
    %cst_160 = arith.constant 0.000000e+00 : f32
    %371 = vector.broadcast %cst_160 : f32 to vector<16x16xf32>
    %372 = arith.maximumf %370, %371 : vector<16x16xf32>
    %373 = arith.addf %350, %372 : vector<16x16xf32>
    %374 = vector.broadcast %280 : f32 to vector<16x16xf32>
    %375 = arith.mulf %374, %305 : vector<16x16xf32>
    %c2_161 = arith.constant 2 : index
    %c0_162 = arith.constant 0 : index
    %376 = vector.load %arg5[%c2_161, %c0_162] : memref<62x16xf32, #tpu.memory_space<vmem>>, vector<16x16xf32>
    %377 = vector.broadcast %272 : f32 to vector<16x16xf32>
    %378 = arith.mulf %377, %376 : vector<16x16xf32>
    %379 = arith.addf %375, %378 : vector<16x16xf32>
    %c13_163 = arith.constant 13 : index
    %c0_164 = arith.constant 0 : index
    %380 = vector.load %arg5[%c13_163, %c0_164] : memref<62x16xf32, #tpu.memory_space<vmem>>, vector<16x16xf32>
    %381 = vector.broadcast %276 : f32 to vector<16x16xf32>
    %382 = arith.mulf %381, %380 : vector<16x16xf32>
    %383 = arith.addf %379, %382 : vector<16x16xf32>
    %c35_165 = arith.constant 35 : index
    %c0_166 = arith.constant 0 : index
    %384 = vector.load %arg5[%c35_165, %c0_166] : memref<62x16xf32, #tpu.memory_space<vmem>>, vector<16x16xf32>
    %385 = vector.broadcast %284 : f32 to vector<16x16xf32>
    %386 = arith.mulf %385, %384 : vector<16x16xf32>
    %387 = arith.addf %383, %386 : vector<16x16xf32>
    %c46_167 = arith.constant 46 : index
    %c0_168 = arith.constant 0 : index
    %388 = vector.load %arg5[%c46_167, %c0_168] : memref<62x16xf32, #tpu.memory_space<vmem>>, vector<16x16xf32>
    %389 = vector.broadcast %288 : f32 to vector<16x16xf32>
    %390 = arith.mulf %389, %388 : vector<16x16xf32>
    %391 = arith.addf %387, %390 : vector<16x16xf32>
    %392 = vector.broadcast %304 : f32 to vector<16x16xf32>
    %393 = arith.addf %391, %392 : vector<16x16xf32>
    %cst_169 = arith.constant 0.000000e+00 : f32
    %394 = vector.broadcast %cst_169 : f32 to vector<16x16xf32>
    %395 = arith.maximumf %393, %394 : vector<16x16xf32>
    %396 = arith.addf %373, %395 : vector<16x16xf32>
    %cst_170 = arith.constant 2.500000e-01 : f32
    %397 = vector.broadcast %cst_170 : f32 to vector<16x16xf32>
    %398 = arith.mulf %396, %397 : vector<16x16xf32>
    %399 = arith.addf %398, %305 : vector<16x16xf32>
    %c0_171 = arith.constant 0 : index
    %c1_172 = arith.constant 1 : index
    %c0_173 = arith.constant 0 : index
    %c0_174 = arith.constant 0 : index
    %400 = vector.load %arg4[%c0_171, %c1_172, %c0_173, %c0_174] : memref<1x4x16x16xf32, #tpu.memory_space<vmem>>, vector<1x1x16x16xf32>
    %401 = vector.shape_cast %400 : vector<1x1x16x16xf32> to vector<16x16xf32>
    %402 = vector.shape_cast %399 : vector<16x16xf32> to vector<1x1x16x16xf32>
    tpu.vector_store %arg4[%c0_171, %c1_172, %c0_173, %c0_174], %402 {strides = array<i32>} : memref<1x4x16x16xf32, #tpu.memory_space<vmem>>, vector<1x1x16x16xf32>,
    %c0_175 = arith.constant 0 : index
    %c2_176 = arith.constant 2 : index
    %c0_177 = arith.constant 0 : index
    %c0_178 = arith.constant 0 : index
    %403 = vector.load %arg3[%c0_175, %c2_176, %c0_177, %c0_178] : memref<1x4x16x16xf32, #tpu.memory_space<vmem>>, vector<1x1x16x16xf32>
    %404 = vector.shape_cast %403 : vector<1x1x16x16xf32> to vector<16x16xf32>
    %c24_179 = arith.constant 24 : index
    %c0_180 = arith.constant 0 : index
    %405 = vector.load %arg5[%c24_179, %c0_180] : memref<62x16xf32, #tpu.memory_space<vmem>>, vector<16x16xf32>
    tpu.vector_store %arg5[%c24_179, %c0_180], %404 {strides = array<i32>} : memref<62x16xf32, #tpu.memory_space<vmem>>, vector<16x16xf32>,
    %c2_i32_181 = arith.constant 2 : i32
    %406 = arith.addi %4, %c2_i32_181 : i32
    %c24_i32_182 = arith.constant 24 : i32
    %407 = arith.muli %406, %c24_i32_182 : i32
    %c0_i32_183 = arith.constant 0 : i32
    %408 = arith.addi %407, %c0_i32_183 : i32
    %c0_i32_184 = arith.constant 0 : i32
    %409 = arith.addi %408, %c0_i32_184 : i32
    %410 = arith.index_cast %409 : i32 to index
    %411 = memref.load %arg2[%410] : memref<96xf32, #tpu.memory_space<smem>>
    %c0_i32_185 = arith.constant 0 : i32
    %412 = arith.addi %407, %c0_i32_185 : i32
    %c1_i32_186 = arith.constant 1 : i32
    %413 = arith.addi %412, %c1_i32_186 : i32
    %414 = arith.index_cast %413 : i32 to index
    %415 = memref.load %arg2[%414] : memref<96xf32, #tpu.memory_space<smem>>
    %c0_i32_187 = arith.constant 0 : i32
    %416 = arith.addi %407, %c0_i32_187 : i32
    %c2_i32_188 = arith.constant 2 : i32
    %417 = arith.addi %416, %c2_i32_188 : i32
    %418 = arith.index_cast %417 : i32 to index
    %419 = memref.load %arg2[%418] : memref<96xf32, #tpu.memory_space<smem>>
    %c0_i32_189 = arith.constant 0 : i32
    %420 = arith.addi %407, %c0_i32_189 : i32
    %c3_i32_190 = arith.constant 3 : i32
    %421 = arith.addi %420, %c3_i32_190 : i32
    %422 = arith.index_cast %421 : i32 to index
    %423 = memref.load %arg2[%422] : memref<96xf32, #tpu.memory_space<smem>>
    %c0_i32_191 = arith.constant 0 : i32
    %424 = arith.addi %407, %c0_i32_191 : i32
    %c4_i32_192 = arith.constant 4 : i32
    %425 = arith.addi %424, %c4_i32_192 : i32
    %426 = arith.index_cast %425 : i32 to index
    %427 = memref.load %arg2[%426] : memref<96xf32, #tpu.memory_space<smem>>
    %c6_i32_193 = arith.constant 6 : i32
    %428 = arith.addi %407, %c6_i32_193 : i32
    %c0_i32_194 = arith.constant 0 : i32
    %429 = arith.addi %428, %c0_i32_194 : i32
    %430 = arith.index_cast %429 : i32 to index
    %431 = memref.load %arg2[%430] : memref<96xf32, #tpu.memory_space<smem>>
    %c6_i32_195 = arith.constant 6 : i32
    %432 = arith.addi %407, %c6_i32_195 : i32
    %c1_i32_196 = arith.constant 1 : i32
    %433 = arith.addi %432, %c1_i32_196 : i32
    %434 = arith.index_cast %433 : i32 to index
    %435 = memref.load %arg2[%434] : memref<96xf32, #tpu.memory_space<smem>>
    %c6_i32_197 = arith.constant 6 : i32
    %436 = arith.addi %407, %c6_i32_197 : i32
    %c2_i32_198 = arith.constant 2 : i32
    %437 = arith.addi %436, %c2_i32_198 : i32
    %438 = arith.index_cast %437 : i32 to index
    %439 = memref.load %arg2[%438] : memref<96xf32, #tpu.memory_space<smem>>
    %c6_i32_199 = arith.constant 6 : i32
    %440 = arith.addi %407, %c6_i32_199 : i32
    %c3_i32_200 = arith.constant 3 : i32
    %441 = arith.addi %440, %c3_i32_200 : i32
    %442 = arith.index_cast %441 : i32 to index
    %443 = memref.load %arg2[%442] : memref<96xf32, #tpu.memory_space<smem>>
    %c6_i32_201 = arith.constant 6 : i32
    %444 = arith.addi %407, %c6_i32_201 : i32
    %c4_i32_202 = arith.constant 4 : i32
    %445 = arith.addi %444, %c4_i32_202 : i32
    %446 = arith.index_cast %445 : i32 to index
    %447 = memref.load %arg2[%446] : memref<96xf32, #tpu.memory_space<smem>>
    %c12_i32_203 = arith.constant 12 : i32
    %448 = arith.addi %407, %c12_i32_203 : i32
    %c0_i32_204 = arith.constant 0 : i32
    %449 = arith.addi %448, %c0_i32_204 : i32
    %450 = arith.index_cast %449 : i32 to index
    %451 = memref.load %arg2[%450] : memref<96xf32, #tpu.memory_space<smem>>
    %c12_i32_205 = arith.constant 12 : i32
    %452 = arith.addi %407, %c12_i32_205 : i32
    %c1_i32_206 = arith.constant 1 : i32
    %453 = arith.addi %452, %c1_i32_206 : i32
    %454 = arith.index_cast %453 : i32 to index
    %455 = memref.load %arg2[%454] : memref<96xf32, #tpu.memory_space<smem>>
    %c12_i32_207 = arith.constant 12 : i32
    %456 = arith.addi %407, %c12_i32_207 : i32
    %c2_i32_208 = arith.constant 2 : i32
    %457 = arith.addi %456, %c2_i32_208 : i32
    %458 = arith.index_cast %457 : i32 to index
    %459 = memref.load %arg2[%458] : memref<96xf32, #tpu.memory_space<smem>>
    %c12_i32_209 = arith.constant 12 : i32
    %460 = arith.addi %407, %c12_i32_209 : i32
    %c3_i32_210 = arith.constant 3 : i32
    %461 = arith.addi %460, %c3_i32_210 : i32
    %462 = arith.index_cast %461 : i32 to index
    %463 = memref.load %arg2[%462] : memref<96xf32, #tpu.memory_space<smem>>
    %c12_i32_211 = arith.constant 12 : i32
    %464 = arith.addi %407, %c12_i32_211 : i32
    %c4_i32_212 = arith.constant 4 : i32
    %465 = arith.addi %464, %c4_i32_212 : i32
    %466 = arith.index_cast %465 : i32 to index
    %467 = memref.load %arg2[%466] : memref<96xf32, #tpu.memory_space<smem>>
    %c18_i32_213 = arith.constant 18 : i32
    %468 = arith.addi %407, %c18_i32_213 : i32
    %c0_i32_214 = arith.constant 0 : i32
    %469 = arith.addi %468, %c0_i32_214 : i32
    %470 = arith.index_cast %469 : i32 to index
    %471 = memref.load %arg2[%470] : memref<96xf32, #tpu.memory_space<smem>>
    %c18_i32_215 = arith.constant 18 : i32
    %472 = arith.addi %407, %c18_i32_215 : i32
    %c1_i32_216 = arith.constant 1 : i32
    %473 = arith.addi %472, %c1_i32_216 : i32
    %474 = arith.index_cast %473 : i32 to index
    %475 = memref.load %arg2[%474] : memref<96xf32, #tpu.memory_space<smem>>
    %c18_i32_217 = arith.constant 18 : i32
    %476 = arith.addi %407, %c18_i32_217 : i32
    %c2_i32_218 = arith.constant 2 : i32
    %477 = arith.addi %476, %c2_i32_218 : i32
    %478 = arith.index_cast %477 : i32 to index
    %479 = memref.load %arg2[%478] : memref<96xf32, #tpu.memory_space<smem>>
    %c18_i32_219 = arith.constant 18 : i32
    %480 = arith.addi %407, %c18_i32_219 : i32
    %c3_i32_220 = arith.constant 3 : i32
    %481 = arith.addi %480, %c3_i32_220 : i32
    %482 = arith.index_cast %481 : i32 to index
    %483 = memref.load %arg2[%482] : memref<96xf32, #tpu.memory_space<smem>>
    %c18_i32_221 = arith.constant 18 : i32
    %484 = arith.addi %407, %c18_i32_221 : i32
    %c4_i32_222 = arith.constant 4 : i32
    %485 = arith.addi %484, %c4_i32_222 : i32
    %486 = arith.index_cast %485 : i32 to index
    %487 = memref.load %arg2[%486] : memref<96xf32, #tpu.memory_space<smem>>
    %c0_i32_223 = arith.constant 0 : i32
    %488 = arith.addi %407, %c0_i32_223 : i32
    %c5_i32_224 = arith.constant 5 : i32
    %489 = arith.addi %488, %c5_i32_224 : i32
    %490 = arith.index_cast %489 : i32 to index
    %491 = memref.load %arg2[%490] : memref<96xf32, #tpu.memory_space<smem>>
    %c6_i32_225 = arith.constant 6 : i32
    %492 = arith.addi %407, %c6_i32_225 : i32
    %c5_i32_226 = arith.constant 5 : i32
    %493 = arith.addi %492, %c5_i32_226 : i32
    %494 = arith.index_cast %493 : i32 to index
    %495 = memref.load %arg2[%494] : memref<96xf32, #tpu.memory_space<smem>>
    %c12_i32_227 = arith.constant 12 : i32
    %496 = arith.addi %407, %c12_i32_227 : i32
    %c5_i32_228 = arith.constant 5 : i32
    %497 = arith.addi %496, %c5_i32_228 : i32
    %498 = arith.index_cast %497 : i32 to index
    %499 = memref.load %arg2[%498] : memref<96xf32, #tpu.memory_space<smem>>
    %c18_i32_229 = arith.constant 18 : i32
    %500 = arith.addi %407, %c18_i32_229 : i32
    %c5_i32_230 = arith.constant 5 : i32
    %501 = arith.addi %500, %c5_i32_230 : i32
    %502 = arith.index_cast %501 : i32 to index
    %503 = memref.load %arg2[%502] : memref<96xf32, #tpu.memory_space<smem>>
    %c24_231 = arith.constant 24 : index
    %c0_232 = arith.constant 0 : index
    %504 = vector.load %arg5[%c24_231, %c0_232] : memref<62x16xf32, #tpu.memory_space<vmem>>, vector<16x16xf32>
    %505 = vector.broadcast %419 : f32 to vector<16x16xf32>
    %506 = arith.mulf %505, %504 : vector<16x16xf32>
    %c20_233 = arith.constant 20 : index
    %c0_234 = arith.constant 0 : index
    %507 = vector.load %arg5[%c20_233, %c0_234] : memref<62x16xf32, #tpu.memory_space<vmem>>, vector<16x16xf32>
    %508 = vector.broadcast %411 : f32 to vector<16x16xf32>
    %509 = arith.mulf %508, %507 : vector<16x16xf32>
    %510 = arith.addf %506, %509 : vector<16x16xf32>
    %c22_235 = arith.constant 22 : index
    %c0_236 = arith.constant 0 : index
    %511 = vector.load %arg5[%c22_235, %c0_236] : memref<62x16xf32, #tpu.memory_space<vmem>>, vector<16x16xf32>
    %512 = vector.broadcast %415 : f32 to vector<16x16xf32>
    %513 = arith.mulf %512, %511 : vector<16x16xf32>
    %514 = arith.addf %510, %513 : vector<16x16xf32>
    %c26_237 = arith.constant 26 : index
    %c0_238 = arith.constant 0 : index
    %515 = vector.load %arg5[%c26_237, %c0_238] : memref<62x16xf32, #tpu.memory_space<vmem>>, vector<16x16xf32>
    %516 = vector.broadcast %423 : f32 to vector<16x16xf32>
    %517 = arith.mulf %516, %515 : vector<16x16xf32>
    %518 = arith.addf %514, %517 : vector<16x16xf32>
    %c28_239 = arith.constant 28 : index
    %c0_240 = arith.constant 0 : index
    %519 = vector.load %arg5[%c28_239, %c0_240] : memref<62x16xf32, #tpu.memory_space<vmem>>, vector<16x16xf32>
    %520 = vector.broadcast %427 : f32 to vector<16x16xf32>
    %521 = arith.mulf %520, %519 : vector<16x16xf32>
    %522 = arith.addf %518, %521 : vector<16x16xf32>
    %523 = vector.broadcast %491 : f32 to vector<16x16xf32>
    %524 = arith.addf %522, %523 : vector<16x16xf32>
    %cst_241 = arith.constant 0.000000e+00 : f32
    %525 = vector.broadcast %cst_241 : f32 to vector<16x16xf32>
    %526 = arith.maximumf %524, %525 : vector<16x16xf32>
    %527 = vector.broadcast %439 : f32 to vector<16x16xf32>
    %528 = arith.mulf %527, %504 : vector<16x16xf32>
    %c14_242 = arith.constant 14 : index
    %c0_243 = arith.constant 0 : index
    %529 = vector.load %arg5[%c14_242, %c0_243] : memref<62x16xf32, #tpu.memory_space<vmem>>, vector<16x16xf32>
    %530 = vector.broadcast %431 : f32 to vector<16x16xf32>
    %531 = arith.mulf %530, %529 : vector<16x16xf32>
    %532 = arith.addf %528, %531 : vector<16x16xf32>
    %c19_244 = arith.constant 19 : index
    %c0_245 = arith.constant 0 : index
    %533 = vector.load %arg5[%c19_244, %c0_245] : memref<62x16xf32, #tpu.memory_space<vmem>>, vector<16x16xf32>
    %534 = vector.broadcast %435 : f32 to vector<16x16xf32>
    %535 = arith.mulf %534, %533 : vector<16x16xf32>
    %536 = arith.addf %532, %535 : vector<16x16xf32>
    %c29_246 = arith.constant 29 : index
    %c0_247 = arith.constant 0 : index
    %537 = vector.load %arg5[%c29_246, %c0_247] : memref<62x16xf32, #tpu.memory_space<vmem>>, vector<16x16xf32>
    %538 = vector.broadcast %443 : f32 to vector<16x16xf32>
    %539 = arith.mulf %538, %537 : vector<16x16xf32>
    %540 = arith.addf %536, %539 : vector<16x16xf32>
    %c34_248 = arith.constant 34 : index
    %c0_249 = arith.constant 0 : index
    %541 = vector.load %arg5[%c34_248, %c0_249] : memref<62x16xf32, #tpu.memory_space<vmem>>, vector<16x16xf32>
    %542 = vector.broadcast %447 : f32 to vector<16x16xf32>
    %543 = arith.mulf %542, %541 : vector<16x16xf32>
    %544 = arith.addf %540, %543 : vector<16x16xf32>
    %545 = vector.broadcast %495 : f32 to vector<16x16xf32>
    %546 = arith.addf %544, %545 : vector<16x16xf32>
    %cst_250 = arith.constant 0.000000e+00 : f32
    %547 = vector.broadcast %cst_250 : f32 to vector<16x16xf32>
    %548 = arith.maximumf %546, %547 : vector<16x16xf32>
    %549 = arith.addf %526, %548 : vector<16x16xf32>
    %550 = vector.broadcast %459 : f32 to vector<16x16xf32>
    %551 = arith.mulf %550, %504 : vector<16x16xf32>
    %c8_251 = arith.constant 8 : index
    %c0_252 = arith.constant 0 : index
    %552 = vector.load %arg5[%c8_251, %c0_252] : memref<62x16xf32, #tpu.memory_space<vmem>>, vector<16x16xf32>
    %553 = vector.broadcast %451 : f32 to vector<16x16xf32>
    %554 = arith.mulf %553, %552 : vector<16x16xf32>
    %555 = arith.addf %551, %554 : vector<16x16xf32>
    %c16_253 = arith.constant 16 : index
    %c0_254 = arith.constant 0 : index
    %556 = vector.load %arg5[%c16_253, %c0_254] : memref<62x16xf32, #tpu.memory_space<vmem>>, vector<16x16xf32>
    %557 = vector.broadcast %455 : f32 to vector<16x16xf32>
    %558 = arith.mulf %557, %556 : vector<16x16xf32>
    %559 = arith.addf %555, %558 : vector<16x16xf32>
    %c32_255 = arith.constant 32 : index
    %c0_256 = arith.constant 0 : index
    %560 = vector.load %arg5[%c32_255, %c0_256] : memref<62x16xf32, #tpu.memory_space<vmem>>, vector<16x16xf32>
    %561 = vector.broadcast %463 : f32 to vector<16x16xf32>
    %562 = arith.mulf %561, %560 : vector<16x16xf32>
    %563 = arith.addf %559, %562 : vector<16x16xf32>
    %c40_257 = arith.constant 40 : index
    %c0_258 = arith.constant 0 : index
    %564 = vector.load %arg5[%c40_257, %c0_258] : memref<62x16xf32, #tpu.memory_space<vmem>>, vector<16x16xf32>
    %565 = vector.broadcast %467 : f32 to vector<16x16xf32>
    %566 = arith.mulf %565, %564 : vector<16x16xf32>
    %567 = arith.addf %563, %566 : vector<16x16xf32>
    %568 = vector.broadcast %499 : f32 to vector<16x16xf32>
    %569 = arith.addf %567, %568 : vector<16x16xf32>
    %cst_259 = arith.constant 0.000000e+00 : f32
    %570 = vector.broadcast %cst_259 : f32 to vector<16x16xf32>
    %571 = arith.maximumf %569, %570 : vector<16x16xf32>
    %572 = arith.addf %549, %571 : vector<16x16xf32>
    %573 = vector.broadcast %479 : f32 to vector<16x16xf32>
    %574 = arith.mulf %573, %504 : vector<16x16xf32>
    %c2_260 = arith.constant 2 : index
    %c0_261 = arith.constant 0 : index
    %575 = vector.load %arg5[%c2_260, %c0_261] : memref<62x16xf32, #tpu.memory_space<vmem>>, vector<16x16xf32>
    %576 = vector.broadcast %471 : f32 to vector<16x16xf32>
    %577 = arith.mulf %576, %575 : vector<16x16xf32>
    %578 = arith.addf %574, %577 : vector<16x16xf32>
    %c13_262 = arith.constant 13 : index
    %c0_263 = arith.constant 0 : index
    %579 = vector.load %arg5[%c13_262, %c0_263] : memref<62x16xf32, #tpu.memory_space<vmem>>, vector<16x16xf32>
    %580 = vector.broadcast %475 : f32 to vector<16x16xf32>
    %581 = arith.mulf %580, %579 : vector<16x16xf32>
    %582 = arith.addf %578, %581 : vector<16x16xf32>
    %c35_264 = arith.constant 35 : index
    %c0_265 = arith.constant 0 : index
    %583 = vector.load %arg5[%c35_264, %c0_265] : memref<62x16xf32, #tpu.memory_space<vmem>>, vector<16x16xf32>
    %584 = vector.broadcast %483 : f32 to vector<16x16xf32>
    %585 = arith.mulf %584, %583 : vector<16x16xf32>
    %586 = arith.addf %582, %585 : vector<16x16xf32>
    %c46_266 = arith.constant 46 : index
    %c0_267 = arith.constant 0 : index
    %587 = vector.load %arg5[%c46_266, %c0_267] : memref<62x16xf32, #tpu.memory_space<vmem>>, vector<16x16xf32>
    %588 = vector.broadcast %487 : f32 to vector<16x16xf32>
    %589 = arith.mulf %588, %587 : vector<16x16xf32>
    %590 = arith.addf %586, %589 : vector<16x16xf32>
    %591 = vector.broadcast %503 : f32 to vector<16x16xf32>
    %592 = arith.addf %590, %591 : vector<16x16xf32>
    %cst_268 = arith.constant 0.000000e+00 : f32
    %593 = vector.broadcast %cst_268 : f32 to vector<16x16xf32>
    %594 = arith.maximumf %592, %593 : vector<16x16xf32>
    %595 = arith.addf %572, %594 : vector<16x16xf32>
    %cst_269 = arith.constant 2.500000e-01 : f32
    %596 = vector.broadcast %cst_269 : f32 to vector<16x16xf32>
    %597 = arith.mulf %595, %596 : vector<16x16xf32>
    %598 = arith.addf %597, %504 : vector<16x16xf32>
    %c0_270 = arith.constant 0 : index
    %c2_271 = arith.constant 2 : index
    %c0_272 = arith.constant 0 : index
    %c0_273 = arith.constant 0 : index
    %599 = vector.load %arg4[%c0_270, %c2_271, %c0_272, %c0_273] : memref<1x4x16x16xf32, #tpu.memory_space<vmem>>, vector<1x1x16x16xf32>
    %600 = vector.shape_cast %599 : vector<1x1x16x16xf32> to vector<16x16xf32>
    %601 = vector.shape_cast %598 : vector<16x16xf32> to vector<1x1x16x16xf32>
    tpu.vector_store %arg4[%c0_270, %c2_271, %c0_272, %c0_273], %601 {strides = array<i32>} : memref<1x4x16x16xf32, #tpu.memory_space<vmem>>, vector<1x1x16x16xf32>,
    %c0_274 = arith.constant 0 : index
    %c3 = arith.constant 3 : index
    %c0_275 = arith.constant 0 : index
    %c0_276 = arith.constant 0 : index
    %602 = vector.load %arg3[%c0_274, %c3, %c0_275, %c0_276] : memref<1x4x16x16xf32, #tpu.memory_space<vmem>>, vector<1x1x16x16xf32>
    %603 = vector.shape_cast %602 : vector<1x1x16x16xf32> to vector<16x16xf32>
    %c24_277 = arith.constant 24 : index
    %c0_278 = arith.constant 0 : index
    %604 = vector.load %arg5[%c24_277, %c0_278] : memref<62x16xf32, #tpu.memory_space<vmem>>, vector<16x16xf32>
    tpu.vector_store %arg5[%c24_277, %c0_278], %603 {strides = array<i32>} : memref<62x16xf32, #tpu.memory_space<vmem>>, vector<16x16xf32>,
    %c3_i32_279 = arith.constant 3 : i32
    %605 = arith.addi %4, %c3_i32_279 : i32
    %c24_i32_280 = arith.constant 24 : i32
    %606 = arith.muli %605, %c24_i32_280 : i32
    %c0_i32_281 = arith.constant 0 : i32
    %607 = arith.addi %606, %c0_i32_281 : i32
    %c0_i32_282 = arith.constant 0 : i32
    %608 = arith.addi %607, %c0_i32_282 : i32
    %609 = arith.index_cast %608 : i32 to index
    %610 = memref.load %arg2[%609] : memref<96xf32, #tpu.memory_space<smem>>
    %c0_i32_283 = arith.constant 0 : i32
    %611 = arith.addi %606, %c0_i32_283 : i32
    %c1_i32_284 = arith.constant 1 : i32
    %612 = arith.addi %611, %c1_i32_284 : i32
    %613 = arith.index_cast %612 : i32 to index
    %614 = memref.load %arg2[%613] : memref<96xf32, #tpu.memory_space<smem>>
    %c0_i32_285 = arith.constant 0 : i32
    %615 = arith.addi %606, %c0_i32_285 : i32
    %c2_i32_286 = arith.constant 2 : i32
    %616 = arith.addi %615, %c2_i32_286 : i32
    %617 = arith.index_cast %616 : i32 to index
    %618 = memref.load %arg2[%617] : memref<96xf32, #tpu.memory_space<smem>>
    %c0_i32_287 = arith.constant 0 : i32
    %619 = arith.addi %606, %c0_i32_287 : i32
    %c3_i32_288 = arith.constant 3 : i32
    %620 = arith.addi %619, %c3_i32_288 : i32
    %621 = arith.index_cast %620 : i32 to index
    %622 = memref.load %arg2[%621] : memref<96xf32, #tpu.memory_space<smem>>
    %c0_i32_289 = arith.constant 0 : i32
    %623 = arith.addi %606, %c0_i32_289 : i32
    %c4_i32_290 = arith.constant 4 : i32
    %624 = arith.addi %623, %c4_i32_290 : i32
    %625 = arith.index_cast %624 : i32 to index
    %626 = memref.load %arg2[%625] : memref<96xf32, #tpu.memory_space<smem>>
    %c6_i32_291 = arith.constant 6 : i32
    %627 = arith.addi %606, %c6_i32_291 : i32
    %c0_i32_292 = arith.constant 0 : i32
    %628 = arith.addi %627, %c0_i32_292 : i32
    %629 = arith.index_cast %628 : i32 to index
    %630 = memref.load %arg2[%629] : memref<96xf32, #tpu.memory_space<smem>>
    %c6_i32_293 = arith.constant 6 : i32
    %631 = arith.addi %606, %c6_i32_293 : i32
    %c1_i32_294 = arith.constant 1 : i32
    %632 = arith.addi %631, %c1_i32_294 : i32
    %633 = arith.index_cast %632 : i32 to index
    %634 = memref.load %arg2[%633] : memref<96xf32, #tpu.memory_space<smem>>
    %c6_i32_295 = arith.constant 6 : i32
    %635 = arith.addi %606, %c6_i32_295 : i32
    %c2_i32_296 = arith.constant 2 : i32
    %636 = arith.addi %635, %c2_i32_296 : i32
    %637 = arith.index_cast %636 : i32 to index
    %638 = memref.load %arg2[%637] : memref<96xf32, #tpu.memory_space<smem>>
    %c6_i32_297 = arith.constant 6 : i32
    %639 = arith.addi %606, %c6_i32_297 : i32
    %c3_i32_298 = arith.constant 3 : i32
    %640 = arith.addi %639, %c3_i32_298 : i32
    %641 = arith.index_cast %640 : i32 to index
    %642 = memref.load %arg2[%641] : memref<96xf32, #tpu.memory_space<smem>>
    %c6_i32_299 = arith.constant 6 : i32
    %643 = arith.addi %606, %c6_i32_299 : i32
    %c4_i32_300 = arith.constant 4 : i32
    %644 = arith.addi %643, %c4_i32_300 : i32
    %645 = arith.index_cast %644 : i32 to index
    %646 = memref.load %arg2[%645] : memref<96xf32, #tpu.memory_space<smem>>
    %c12_i32_301 = arith.constant 12 : i32
    %647 = arith.addi %606, %c12_i32_301 : i32
    %c0_i32_302 = arith.constant 0 : i32
    %648 = arith.addi %647, %c0_i32_302 : i32
    %649 = arith.index_cast %648 : i32 to index
    %650 = memref.load %arg2[%649] : memref<96xf32, #tpu.memory_space<smem>>
    %c12_i32_303 = arith.constant 12 : i32
    %651 = arith.addi %606, %c12_i32_303 : i32
    %c1_i32_304 = arith.constant 1 : i32
    %652 = arith.addi %651, %c1_i32_304 : i32
    %653 = arith.index_cast %652 : i32 to index
    %654 = memref.load %arg2[%653] : memref<96xf32, #tpu.memory_space<smem>>
    %c12_i32_305 = arith.constant 12 : i32
    %655 = arith.addi %606, %c12_i32_305 : i32
    %c2_i32_306 = arith.constant 2 : i32
    %656 = arith.addi %655, %c2_i32_306 : i32
    %657 = arith.index_cast %656 : i32 to index
    %658 = memref.load %arg2[%657] : memref<96xf32, #tpu.memory_space<smem>>
    %c12_i32_307 = arith.constant 12 : i32
    %659 = arith.addi %606, %c12_i32_307 : i32
    %c3_i32_308 = arith.constant 3 : i32
    %660 = arith.addi %659, %c3_i32_308 : i32
    %661 = arith.index_cast %660 : i32 to index
    %662 = memref.load %arg2[%661] : memref<96xf32, #tpu.memory_space<smem>>
    %c12_i32_309 = arith.constant 12 : i32
    %663 = arith.addi %606, %c12_i32_309 : i32
    %c4_i32_310 = arith.constant 4 : i32
    %664 = arith.addi %663, %c4_i32_310 : i32
    %665 = arith.index_cast %664 : i32 to index
    %666 = memref.load %arg2[%665] : memref<96xf32, #tpu.memory_space<smem>>
    %c18_i32_311 = arith.constant 18 : i32
    %667 = arith.addi %606, %c18_i32_311 : i32
    %c0_i32_312 = arith.constant 0 : i32
    %668 = arith.addi %667, %c0_i32_312 : i32
    %669 = arith.index_cast %668 : i32 to index
    %670 = memref.load %arg2[%669] : memref<96xf32, #tpu.memory_space<smem>>
    %c18_i32_313 = arith.constant 18 : i32
    %671 = arith.addi %606, %c18_i32_313 : i32
    %c1_i32_314 = arith.constant 1 : i32
    %672 = arith.addi %671, %c1_i32_314 : i32
    %673 = arith.index_cast %672 : i32 to index
    %674 = memref.load %arg2[%673] : memref<96xf32, #tpu.memory_space<smem>>
    %c18_i32_315 = arith.constant 18 : i32
    %675 = arith.addi %606, %c18_i32_315 : i32
    %c2_i32_316 = arith.constant 2 : i32
    %676 = arith.addi %675, %c2_i32_316 : i32
    %677 = arith.index_cast %676 : i32 to index
    %678 = memref.load %arg2[%677] : memref<96xf32, #tpu.memory_space<smem>>
    %c18_i32_317 = arith.constant 18 : i32
    %679 = arith.addi %606, %c18_i32_317 : i32
    %c3_i32_318 = arith.constant 3 : i32
    %680 = arith.addi %679, %c3_i32_318 : i32
    %681 = arith.index_cast %680 : i32 to index
    %682 = memref.load %arg2[%681] : memref<96xf32, #tpu.memory_space<smem>>
    %c18_i32_319 = arith.constant 18 : i32
    %683 = arith.addi %606, %c18_i32_319 : i32
    %c4_i32_320 = arith.constant 4 : i32
    %684 = arith.addi %683, %c4_i32_320 : i32
    %685 = arith.index_cast %684 : i32 to index
    %686 = memref.load %arg2[%685] : memref<96xf32, #tpu.memory_space<smem>>
    %c0_i32_321 = arith.constant 0 : i32
    %687 = arith.addi %606, %c0_i32_321 : i32
    %c5_i32_322 = arith.constant 5 : i32
    %688 = arith.addi %687, %c5_i32_322 : i32
    %689 = arith.index_cast %688 : i32 to index
    %690 = memref.load %arg2[%689] : memref<96xf32, #tpu.memory_space<smem>>
    %c6_i32_323 = arith.constant 6 : i32
    %691 = arith.addi %606, %c6_i32_323 : i32
    %c5_i32_324 = arith.constant 5 : i32
    %692 = arith.addi %691, %c5_i32_324 : i32
    %693 = arith.index_cast %692 : i32 to index
    %694 = memref.load %arg2[%693] : memref<96xf32, #tpu.memory_space<smem>>
    %c12_i32_325 = arith.constant 12 : i32
    %695 = arith.addi %606, %c12_i32_325 : i32
    %c5_i32_326 = arith.constant 5 : i32
    %696 = arith.addi %695, %c5_i32_326 : i32
    %697 = arith.index_cast %696 : i32 to index
    %698 = memref.load %arg2[%697] : memref<96xf32, #tpu.memory_space<smem>>
    %c18_i32_327 = arith.constant 18 : i32
    %699 = arith.addi %606, %c18_i32_327 : i32
    %c5_i32_328 = arith.constant 5 : i32
    %700 = arith.addi %699, %c5_i32_328 : i32
    %701 = arith.index_cast %700 : i32 to index
    %702 = memref.load %arg2[%701] : memref<96xf32, #tpu.memory_space<smem>>
    %c24_329 = arith.constant 24 : index
    %c0_330 = arith.constant 0 : index
    %703 = vector.load %arg5[%c24_329, %c0_330] : memref<62x16xf32, #tpu.memory_space<vmem>>, vector<16x16xf32>
    %704 = vector.broadcast %618 : f32 to vector<16x16xf32>
    %705 = arith.mulf %704, %703 : vector<16x16xf32>
    %c20_331 = arith.constant 20 : index
    %c0_332 = arith.constant 0 : index
    %706 = vector.load %arg5[%c20_331, %c0_332] : memref<62x16xf32, #tpu.memory_space<vmem>>, vector<16x16xf32>
    %707 = vector.broadcast %610 : f32 to vector<16x16xf32>
    %708 = arith.mulf %707, %706 : vector<16x16xf32>
    %709 = arith.addf %705, %708 : vector<16x16xf32>
    %c22_333 = arith.constant 22 : index
    %c0_334 = arith.constant 0 : index
    %710 = vector.load %arg5[%c22_333, %c0_334] : memref<62x16xf32, #tpu.memory_space<vmem>>, vector<16x16xf32>
    %711 = vector.broadcast %614 : f32 to vector<16x16xf32>
    %712 = arith.mulf %711, %710 : vector<16x16xf32>
    %713 = arith.addf %709, %712 : vector<16x16xf32>
    %c26_335 = arith.constant 26 : index
    %c0_336 = arith.constant 0 : index
    %714 = vector.load %arg5[%c26_335, %c0_336] : memref<62x16xf32, #tpu.memory_space<vmem>>, vector<16x16xf32>
    %715 = vector.broadcast %622 : f32 to vector<16x16xf32>
    %716 = arith.mulf %715, %714 : vector<16x16xf32>
    %717 = arith.addf %713, %716 : vector<16x16xf32>
    %c28_337 = arith.constant 28 : index
    %c0_338 = arith.constant 0 : index
    %718 = vector.load %arg5[%c28_337, %c0_338] : memref<62x16xf32, #tpu.memory_space<vmem>>, vector<16x16xf32>
    %719 = vector.broadcast %626 : f32 to vector<16x16xf32>
    %720 = arith.mulf %719, %718 : vector<16x16xf32>
    %721 = arith.addf %717, %720 : vector<16x16xf32>
    %722 = vector.broadcast %690 : f32 to vector<16x16xf32>
    %723 = arith.addf %721, %722 : vector<16x16xf32>
    %cst_339 = arith.constant 0.000000e+00 : f32
    %724 = vector.broadcast %cst_339 : f32 to vector<16x16xf32>
    %725 = arith.maximumf %723, %724 : vector<16x16xf32>
    %726 = vector.broadcast %638 : f32 to vector<16x16xf32>
    %727 = arith.mulf %726, %703 : vector<16x16xf32>
    %c14_340 = arith.constant 14 : index
    %c0_341 = arith.constant 0 : index
    %728 = vector.load %arg5[%c14_340, %c0_341] : memref<62x16xf32, #tpu.memory_space<vmem>>, vector<16x16xf32>
    %729 = vector.broadcast %630 : f32 to vector<16x16xf32>
    %730 = arith.mulf %729, %728 : vector<16x16xf32>
    %731 = arith.addf %727, %730 : vector<16x16xf32>
    %c19_342 = arith.constant 19 : index
    %c0_343 = arith.constant 0 : index
    %732 = vector.load %arg5[%c19_342, %c0_343] : memref<62x16xf32, #tpu.memory_space<vmem>>, vector<16x16xf32>
    %733 = vector.broadcast %634 : f32 to vector<16x16xf32>
    %734 = arith.mulf %733, %732 : vector<16x16xf32>
    %735 = arith.addf %731, %734 : vector<16x16xf32>
    %c29_344 = arith.constant 29 : index
    %c0_345 = arith.constant 0 : index
    %736 = vector.load %arg5[%c29_344, %c0_345] : memref<62x16xf32, #tpu.memory_space<vmem>>, vector<16x16xf32>
    %737 = vector.broadcast %642 : f32 to vector<16x16xf32>
    %738 = arith.mulf %737, %736 : vector<16x16xf32>
    %739 = arith.addf %735, %738 : vector<16x16xf32>
    %c34_346 = arith.constant 34 : index
    %c0_347 = arith.constant 0 : index
    %740 = vector.load %arg5[%c34_346, %c0_347] : memref<62x16xf32, #tpu.memory_space<vmem>>, vector<16x16xf32>
    %741 = vector.broadcast %646 : f32 to vector<16x16xf32>
    %742 = arith.mulf %741, %740 : vector<16x16xf32>
    %743 = arith.addf %739, %742 : vector<16x16xf32>
    %744 = vector.broadcast %694 : f32 to vector<16x16xf32>
    %745 = arith.addf %743, %744 : vector<16x16xf32>
    %cst_348 = arith.constant 0.000000e+00 : f32
    %746 = vector.broadcast %cst_348 : f32 to vector<16x16xf32>
    %747 = arith.maximumf %745, %746 : vector<16x16xf32>
    %748 = arith.addf %725, %747 : vector<16x16xf32>
    %749 = vector.broadcast %658 : f32 to vector<16x16xf32>
    %750 = arith.mulf %749, %703 : vector<16x16xf32>
    %c8_349 = arith.constant 8 : index
    %c0_350 = arith.constant 0 : index
    %751 = vector.load %arg5[%c8_349, %c0_350] : memref<62x16xf32, #tpu.memory_space<vmem>>, vector<16x16xf32>
    %752 = vector.broadcast %650 : f32 to vector<16x16xf32>
    %753 = arith.mulf %752, %751 : vector<16x16xf32>
    %754 = arith.addf %750, %753 : vector<16x16xf32>
    %c16_351 = arith.constant 16 : index
    %c0_352 = arith.constant 0 : index
    %755 = vector.load %arg5[%c16_351, %c0_352] : memref<62x16xf32, #tpu.memory_space<vmem>>, vector<16x16xf32>
    %756 = vector.broadcast %654 : f32 to vector<16x16xf32>
    %757 = arith.mulf %756, %755 : vector<16x16xf32>
    %758 = arith.addf %754, %757 : vector<16x16xf32>
    %c32_353 = arith.constant 32 : index
    %c0_354 = arith.constant 0 : index
    %759 = vector.load %arg5[%c32_353, %c0_354] : memref<62x16xf32, #tpu.memory_space<vmem>>, vector<16x16xf32>
    %760 = vector.broadcast %662 : f32 to vector<16x16xf32>
    %761 = arith.mulf %760, %759 : vector<16x16xf32>
    %762 = arith.addf %758, %761 : vector<16x16xf32>
    %c40_355 = arith.constant 40 : index
    %c0_356 = arith.constant 0 : index
    %763 = vector.load %arg5[%c40_355, %c0_356] : memref<62x16xf32, #tpu.memory_space<vmem>>, vector<16x16xf32>
    %764 = vector.broadcast %666 : f32 to vector<16x16xf32>
    %765 = arith.mulf %764, %763 : vector<16x16xf32>
    %766 = arith.addf %762, %765 : vector<16x16xf32>
    %767 = vector.broadcast %698 : f32 to vector<16x16xf32>
    %768 = arith.addf %766, %767 : vector<16x16xf32>
    %cst_357 = arith.constant 0.000000e+00 : f32
    %769 = vector.broadcast %cst_357 : f32 to vector<16x16xf32>
    %770 = arith.maximumf %768, %769 : vector<16x16xf32>
    %771 = arith.addf %748, %770 : vector<16x16xf32>
    %772 = vector.broadcast %678 : f32 to vector<16x16xf32>
    %773 = arith.mulf %772, %703 : vector<16x16xf32>
    %c2_358 = arith.constant 2 : index
    %c0_359 = arith.constant 0 : index
    %774 = vector.load %arg5[%c2_358, %c0_359] : memref<62x16xf32, #tpu.memory_space<vmem>>, vector<16x16xf32>
    %775 = vector.broadcast %670 : f32 to vector<16x16xf32>
    %776 = arith.mulf %775, %774 : vector<16x16xf32>
    %777 = arith.addf %773, %776 : vector<16x16xf32>
    %c13_360 = arith.constant 13 : index
    %c0_361 = arith.constant 0 : index
    %778 = vector.load %arg5[%c13_360, %c0_361] : memref<62x16xf32, #tpu.memory_space<vmem>>, vector<16x16xf32>
    %779 = vector.broadcast %674 : f32 to vector<16x16xf32>
    %780 = arith.mulf %779, %778 : vector<16x16xf32>
    %781 = arith.addf %777, %780 : vector<16x16xf32>
    %c35_362 = arith.constant 35 : index
    %c0_363 = arith.constant 0 : index
    %782 = vector.load %arg5[%c35_362, %c0_363] : memref<62x16xf32, #tpu.memory_space<vmem>>, vector<16x16xf32>
    %783 = vector.broadcast %682 : f32 to vector<16x16xf32>
    %784 = arith.mulf %783, %782 : vector<16x16xf32>
    %785 = arith.addf %781, %784 : vector<16x16xf32>
    %c46_364 = arith.constant 46 : index
    %c0_365 = arith.constant 0 : index
    %786 = vector.load %arg5[%c46_364, %c0_365] : memref<62x16xf32, #tpu.memory_space<vmem>>, vector<16x16xf32>
    %787 = vector.broadcast %686 : f32 to vector<16x16xf32>
    %788 = arith.mulf %787, %786 : vector<16x16xf32>
    %789 = arith.addf %785, %788 : vector<16x16xf32>
    %790 = vector.broadcast %702 : f32 to vector<16x16xf32>
    %791 = arith.addf %789, %790 : vector<16x16xf32>
    %cst_366 = arith.constant 0.000000e+00 : f32
    %792 = vector.broadcast %cst_366 : f32 to vector<16x16xf32>
    %793 = arith.maximumf %791, %792 : vector<16x16xf32>
    %794 = arith.addf %771, %793 : vector<16x16xf32>
    %cst_367 = arith.constant 2.500000e-01 : f32
    %795 = vector.broadcast %cst_367 : f32 to vector<16x16xf32>
    %796 = arith.mulf %794, %795 : vector<16x16xf32>
    %797 = arith.addf %796, %703 : vector<16x16xf32>
    %c0_368 = arith.constant 0 : index
    %c3_369 = arith.constant 3 : index
    %c0_370 = arith.constant 0 : index
    %c0_371 = arith.constant 0 : index
    %798 = vector.load %arg4[%c0_368, %c3_369, %c0_370, %c0_371] : memref<1x4x16x16xf32, #tpu.memory_space<vmem>>, vector<1x1x16x16xf32>
    %799 = vector.shape_cast %798 : vector<1x1x16x16xf32> to vector<16x16xf32>
    %800 = vector.shape_cast %797 : vector<16x16xf32> to vector<1x1x16x16xf32>
    tpu.vector_store %arg4[%c0_368, %c3_369, %c0_370, %c0_371], %800 {strides = array<i32>} : memref<1x4x16x16xf32, #tpu.memory_space<vmem>>, vector<1x1x16x16xf32>,
    return
  }
  func.func @transform_0(%arg0: i32, %arg1: i32) -> i32 {
    %c0_i32 = arith.constant 0 : i32
    %c0_i32_0 = arith.constant 0 : i32
    return %c0_i32 : i32
  }
  func.func @transform_1(%arg0: i32, %arg1: i32) -> (i32, i32, i32, i32) {
    %c0_i32 = arith.constant 0 : i32
    %c0_i32_0 = arith.constant 0 : i32
    %c0_i32_1 = arith.constant 0 : i32
    return %arg0, %arg1, %c0_i32, %c0_i32_0 : i32, i32, i32, i32
  }
  func.func @transform_2(%arg0: i32, %arg1: i32) -> (i32, i32, i32, i32) {
    %c0_i32 = arith.constant 0 : i32
    %c0_i32_0 = arith.constant 0 : i32
    %c0_i32_1 = arith.constant 0 : i32
    return %arg0, %arg1, %c0_i32, %c0_i32_0 : i32, i32, i32, i32
  }
}

</mosaic_0001>

<bundles_post_ra>
// kernel: ms_tcn_long_forward.1
= control target key start
LH: loop header
LB: loop body
LE: loop exit
PB: predicated region body
PF: predicated region fallthrough
CT: control target
= control target key end

     0   :  { %s2588_s0 = inlined_call_operand.vmem [shape: f32[96], index: 0, kind: input, shape index: {}]   ;;  %s2589_s1 = inlined_call_operand.hbm [shape: f32[2,4,16,16], index: 1, kind: input, shape index: {}]   ;;  %s2590_s2 = inlined_call_operand.hbm [shape: f32[2,4,16,16], index: 2, kind: output, shape index: {}]  }
   0x1   :  { %2620 = sst [smem:[#allocation25_spill]] %s2588_s0 }
   0x2   :  { %2621 = sst [smem:[#allocation26_spill]] %s2589_s1 }
   0x3   :  { %7 = vsyncpa [#allocation6], 0 }
   0x4   :  { %8 = vsyncpa [#allocation4], 0 }
   0x5   :  { %10 = vsyncpa [#allocation4 + $0x1], 0 }
   0x6   :  { %11 = vsyncpa [#allocation5], 0 }
   0x7   :  { %13 = vsyncpa [#allocation5 + $0x1], 0  ;;  %s1510_s9 = smov 0   ;;  %s1512_s10 = smov 0  }
   0x8   :  { %s1514_s11 = smov 0   ;;  %s1516_s12 = smov 0  }
   0x9   :  { %s1518_s13 = smov 0   ;;  %s1520_s14 = smov 0  }
   0xa LB: > { %2622 = sst [smem:[#allocation12_spill]] %s1469_s10  ;;  %s1143_s15 = sadd.s32 4294967295, %s1485_s14   ;;  %s1485_s14 = sphi %s1520_s14, %s19_s14   ;;  %s1481_s13 = sphi %s1518_s13, %s2687_s13   ;;  %s1477_s12 = sphi %s1516_s12, %s2686_s12   ;;  %s1473_s11 = sphi %s1514_s11, %s2685_s11   ;;  %s1469_s10 = sphi %s1512_s10, %s2684_s10   ;;  %s1465_s9 = sphi %s1510_s9, %s2683_s9  }
   0xb   : > { %2623 = sst [smem:[#allocation13_spill]] %s1473_s11  ;;  %s1144_s16 = sadd.s32 4294967294, %s1485_s14  }
   0xc   : > { %2624 = sst [smem:[#allocation14_spill]] %s1481_s13  ;;  %s61_s17 = sadd.s32 1, %s1473_s11 }
   0xd   : > { %2625 = sst [smem:[#allocation15_spill]] %s1485_s14  ;;  %p68_p0 = scmp.ne.s32.totalorder %s1473_s11, %s1469_s10 }
   0xe   : > { %p69_p1 = scmp.eq.s32.totalorder %s1485_s14, 0  ;;  %p74_p2 = scmp.ne.s32.totalorder %s1469_s10, %s1465_s9 }
   0xf   : > { %p1548_p3 = scmp.eq.s32.totalorder %s1143_s15, 0  ;;  %p100_p4 = scmp.eq.s32.totalorder %s1143_s15, 1 }
  0x10   : > { %p1552_p5 = por %p69_p1, %p68_p0  ;;  %p106_p6 = scmp.eq.s32.totalorder %s1144_s16, 1 }
  0x11   : > { %s2626_s18 = scalar_select %p1548_p3, 1, 0 }
  0x12   : > { %p1558_p7 = por %p1548_p3, %p74_p2  ;;  %p1562_p8 = por %p100_p4, %p68_p0 }
  0x13   : > { %p1566_p9 = por %p106_p6, %p74_p2  ;;  %p1145_p10 = scmp.ge.s32.totalorder %s1485_s14, 1 }
  0x14   : > { %s2628_s20 = scalar_select %p1558_p7, 1, 0 }
  0x15   : > { %s2629_s21 = scalar_select %p1562_p8, 1, 0 }
  0x16   : > { %s2630_s22 = scalar_select %p1566_p9, 1, 0 }
  0x17   : > { %p113_p11 = scmp.lt.s32.totalorder %s1485_s14, 3  ;;  %s2631_s0 = sld [smem:[#allocation25_spill]] }
  0x18   : > { %p1290_p0 = scmp.lt.s32.totalorder %s1485_s14, 2  ;;  %s31_s29 = sadd.s32 1, %s1481_s13 }
  0x19   : > { %p1575_p12 = pnand %p1145_p10, %p113_p11  ;;  %p1596_p6 = scmp.ge.s32.totalorder %s31_s29, 2 }
  0x1a   : > { %p1585_p2 = pnand %p1290_p0, %p1552_p5  ;;  %s137_s3 = sand.u32 1, %s1473_s11  }
  0x1b   : > { %p1277_p1 = pneg %p1575_p12 }
  0x1d   : > { %s126_s25 = sshll.u32 %s2631_s0, 4  ;;  %p1591_p4 = pnand %p1277_p1, %p1548_p3  ;;  %s127_s25 = int_to_ptr.vmem [resolvable:$true] %s126_s25 }
  0x1e   : > { %s1354_s4 = scalar_lea.vmem %s127_s25, 16  ;;  %p1362_p13 = scmp.lt.s32.totalorder %s127_s25, %s127_s25 }
  0x1f   : > { %p1355_p10 = scmp.ne.s32.totalorder %s127_s25, %s1354_s4  ;;  %p1356_p11 = pneg %p1591_p4 }
  0x20   : > { %p1363_p9 = scmp.lt.s32.totalorder %s1354_s4, %s1354_s4 }
  0x21   : > { %p1357_p5 = pnand %p1356_p11, %p1355_p10 }
  0x22   : > { %p1364_p8 = por %p1363_p9, %p1362_p13 }
  0x23   : > { %p1358_p0 = pneg %p1357_p5 }
  0x25   : > { %p1365_p1 = pnand %p1364_p8, %p1358_p0 }
  0x27   : > { %1368 = shalt.err (!%p1365_p1)
}
  0x28   : > { %s1487_s5 = smov [#allocation3]   ;;  %s2689_s29 = smov (%p1596_p6, %s31_s29), 0 }
  0x29   : > { %1280 = dma.vmem_to_smem (!%p1591_p4), %s127_s25, 16, %s1487_s5, [#allocation6]  }
  0x2a   : > { %2636 = sst [smem:[#allocation16_spill]] %s2689_s29  ;;  %s1148_s6 = sshll.u32 %s137_s3, 6 }
  0x2b   : > { %s56_s7 = ssub.s32 %s1481_s13, %s2689_s29  ;;  %s1267_s8 = sshll.u32 %s1481_s13, 10 }
  0x2c   : > { %p59_p9 = scmp.eq.s32.totalorder %s56_s7, 0  ;;  %s2637_s1 = sld [smem:[#allocation26_spill]] }
  0x2d   : > { %s141_s23 = scalar_lea.vmem [#allocation7], %s1148_s6  ;;  %s1624_s28 = scalar_lea.sflag [#allocation4], %s137_s3 }
  0x2e   : > { %s151_s24 = sshll.u32 %s141_s23, 4  ;;  %p1371_p13 = pneg %p1585_p2  ;;  %s1622_s24 = int_to_ptr.vmem [resolvable:$true] %s151_s24 }
  0x2f   : > { %s1620_s25 = scalar_select %p59_p9, %s1473_s11, %s61_s17  }
  0x31   : > { %2638 = sst [smem:[#allocation17_spill]] %s1620_s25 }
  0x32   : > { %s1615_s19 = scalar_lea.hbm %s2637_s1, %s1267_s8  ;;  %s1374_s6 = scalar_lea.hbm %s2637_s1, 2048 }
  0x33   : > { %s1369_s30 = scalar_lea.hbm %s1615_s19, 1024  ;;  %p1375_p10 = scmp.lt.u32.totalorder %s1615_s19, %s2637_s1 }
  0x34   : > { %p1370_p8 = scmp.ne.s32.totalorder %s1615_s19, %s1369_s30  ;;  %p1376_p11 = scmp.lt.u32.totalorder %s1374_s6, %s1369_s30 }
  0x35   : > { %p1378_p0 = scmp.lt.u32.totalorder %s1369_s30, %s1615_s19 }
  0x36   : > { %p1372_p4 = pnand %p1371_p13, %p1370_p8  ;;  %p1377_p5 = por %p1376_p11, %p1375_p10 }
  0x38   : > { %p1373_p6 = pneg %p1372_p4  ;;  %p1379_p1 = por %p1378_p0, %p1377_p5 }
  0x3a   : > { %p1380_p9 = pnand %p1379_p1, %p1373_p6 }
  0x3c   : > { %1383 = shalt.err (!%p1380_p9)
}
  0x3d   : > { %s1384_s17 = scalar_lea.vmem %s1622_s24, 1024  ;;  %s1488_s3 = smov [#allocation7]  }
  0x3e   : > { %p1385_p8 = scmp.ne.s32.totalorder %s1622_s24, %s1384_s17  ;;  %s1389_s15 = sshll.u32 %s1488_s3, 4  ;;  %s1390_s15 = int_to_ptr.vmem [resolvable:$false] %s1389_s15 }
  0x3f   : > { %s1391_s16 = scalar_lea.vmem %s1390_s15, 2048  ;;  %p1392_p3 = scmp.lt.s32.totalorder %s1622_s24, %s1390_s15 }
  0x40   : > { %p1387_p4 = pnand %p1385_p8, %p1371_p13  ;;  %p1393_p10 = scmp.lt.s32.totalorder %s1391_s16, %s1384_s17 }
  0x42   : > { %p1388_p7 = pneg %p1387_p4  ;;  %p1394_p11 = por %p1393_p10, %p1392_p3 }
  0x44   : > { %p1395_p5 = pnand %p1394_p11, %p1388_p7 }
  0x46   : > { %1398 = shalt.err (!%p1395_p5)
}
  0x47   : > { %s1489_s23 = smov 128   ;;  %s1490_s30 = smov 8  }
  0x48   : > { %1284 = dma.hbm_to_vmem [thread:$0]  (!%p1585_p2), %s1615_s19, 1024, %s1622_s24, %s1624_s28, %s1489_s23, %s1489_s23, %s1490_s30  }
  0x49   : > { %163 = sbr.rel (%p1575_p12) target bundleno = 254 (0xfe), region = 28 }
  0x50   : > { %p2639_p13 = scmp.ne.s32.totalorder %s2626_s18, 0 }
  0x52   : > { %1452 = dma.done.wait (%p2639_p13), [#allocation6], 16  }
  0x53   : > { %1454 = vsyncadd (%p2639_p13), [#allocation6], 4294967280  ;;  %s1659_s4 = sand.u32 1, %s1469_s10   ;;  %p2640_p3 = scmp.ne.s32.totalorder %s2628_s20, 0 }
  0x54   : > { %s2595_s5 = sshll.u32 %s1659_s4, 6  ;;  %s170_s6 = scalar_lea.sflag [#allocation4], %s1659_s4 }
  0x55   : > { %s1665_s27 = scalar_lea.vmem [#allocation7], %s2595_s5 }
  0x56   : > { %1456 = dma.done.wait (%p2640_p3), %s170_s6, 1024  }
  0x57   : > { %1458 = vsyncadd (%p2640_p3), %s170_s6, 4294966272 }
  0x58   : > { %178 = sfence }
  0x59   : > { %vm197_vm0 = vcmask 130048   ;;  %v206_v0 = vld [vmem:[%s1665_s27] sm:$0xff]  ;;  %v207_v1 = vld [vmem:[%s1665_s27 + $0x8] sm:$0xff]  ;;  %vm203_vm1 = vcmask 128000   ;;  %v1491_v2 = vmov 0.0   ;;  %s1680_s18 = sld [smem:[#allocation3]] }
  0x5a   : > { %198 = vst.msk [vmem:[#allocation2] sm:$0xff] %vm197_vm0, %v1491_v2  ;;  %199 = vst.msk [vmem:[#allocation2 + $0x8] sm:$0xff] %vm197_vm0, %v1491_v2  ;;  %s1682_s20 = sld [smem:[#allocation3 + $0x1]]  ;;  %s1684_s26 = sld [smem:[#allocation3 + $0x2]]  ;;  %v1178_v7 = vld [vmem:[%s1665_s27 + $0x10] sm:$0xff]  ;;  %v1179_v8 = vld [vmem:[%s1665_s27 + $0x18] sm:$0xff] }
  0x5b   : > { %200 = vst.msk [vmem:[#allocation2 + $0x10] sm:$0xff] %vm197_vm0, %v1491_v2  ;;  %201 = vst.msk [vmem:[#allocation2 + $0x28] sm:$0xff] %vm197_vm0, %v1491_v2  ;;  %s1686_s19 = sld [smem:[#allocation3 + $0x3]]  ;;  %s1688_s24 = sld [smem:[#allocation3 + $0x4]] }
  0x5c   : > { %202 = vst.msk [vmem:[#allocation2 + $0x30] sm:$0xff] %vm197_vm0, %v1491_v2  ;;  %208 = vst.msk [vmem:[#allocation2 + $0x18] sm:$0xff] %vm197_vm0, %v206_v0  ;;  %s1690_s28 = sld [smem:[#allocation3 + $0x6]]  ;;  %s1692_s7 = sld [smem:[#allocation3 + $0x7]] }
  0x5d   : > { %209 = vst.msk [vmem:[#allocation2 + $0x20] sm:$0xff] %vm197_vm0, %v207_v1  ;;  %s1694_s8 = sld [smem:[#allocation3 + $0x8]]  ;;  %s1696_s17 = sld [smem:[#allocation3 + $0x9]] }
  0x5e   : > { %204 = vst.msk [vmem:[#allocation2 + $0x38] sm:$0x3f] %vm203_vm1, %v1491_v2  ;;  %s1698_s3 = sld [smem:[#allocation3 + $0xa]]  ;;  %s1700_s15 = sld [smem:[#allocation3 + $0xc]] }
  0x5f   : > { %s1702_s16 = sld [smem:[#allocation3 + $0xd]]  ;;  %s1704_s23 = sld [smem:[#allocation3 + $0xe]]  ;;  %v265_v3 = vstv %s1680_s18 }
  0x60   : > { %s1713_s30 = sld [smem:[#allocation3 + $0xf]]  ;;  %v260_v9 = vstv %s1684_s26  ;;  %v272_v10 = vstv %s1682_s20  ;;  %s1721_s6 = sld [smem:[#allocation3 + $0x10]] }
  0x61   : > { %v279_v17 = vstv %s1686_s19  ;;  %s1732_s26 = sld [smem:[#allocation3 + $0x12]]  ;;  %v285_v21 = vstv %s1688_s24  ;;  %s1746_s5 = sld [smem:[#allocation3 + $0x13]]  ;;  %v1778_v44 = vld [vmem:[#allocation2 + $0x8] sm:$0xff] }
  0x62   : > { %v299_v22 = vstv %s1690_s28  ;;  %v306_v23 = vstv %s1692_s7  ;;  %s1755_s0 = sld [smem:[#allocation3 + $0x14]]  ;;  %s1766_s1 = sld [smem:[#allocation3 + $0x15]]  ;;  %v1770_v40 = vld [vmem:[#allocation2 + $0xe] sm:$0xff]  ;;  %v1807_v55 = vld [vmem:[#allocation2 + $0x2] sm:$0xff] }
  0x63   : > { %v1707_v4 = vld [vmem:[#allocation2 + $0x18] sm:$0xff]  ;;  %v295_v31 = vstv %s1694_s8  ;;  %v313_v37 = vstv %s1696_s17  ;;  %s1768_s29 = sld [smem:[#allocation3 + $0x16]]  ;;  %s1780_s13 = sld [smem:[#allocation3 + $0x5]]  ;;  %v300_v45 = vmul.f32 %v299_v22, %v1770_v40  ;;  %v1790_v47 = vld [vmem:[#allocation2 + $0x10] sm:$0xff]  ;;  %v1794_v50 = vld [vmem:[#allocation2 + $0x28] sm:$0xff] }
  0x64   : > { %v263_v5 = vld [vmem:[#allocation2 + $0x14] sm:$0xff]  ;;  %v1719_v13 = vld [vmem:[#allocation2 + $0x20] sm:$0xff]  ;;  %v261_v14 = vmul.f32 %v260_v9, %v1707_v4  ;;  %v296_v35 = vmul.f32 %v295_v31, %v1707_v4  ;;  %v319_v38 = vstv %s1698_s3  ;;  %s1782_s25 = sld [smem:[#allocation3 + $0xb]]  ;;  %v336_v48 = vstv %s1700_s15  ;;  %s1796_s11 = sld [smem:[#allocation3 + $0x11]] }
  0x65   : > { %v1709_v6 = vld [vmem:[#allocation2 + $0x16] sm:$0xff]  ;;  %v266_v15 = vmul.f32 %v265_v3, %v263_v5  ;;  %v1730_v19 = vld [vmem:[#allocation2 + $0x1e] sm:$0xff]  ;;  %v1738_v24 = vmul.f32 %v260_v9, %v1719_v13  ;;  %v331_v43 = vstv %s1704_s23  ;;  %v341_v49 = vstv %s1702_s16  ;;  %s1798_s10 = sld [smem:[#allocation3 + $0x17]]  ;;  %v1814_v60 = vld [vmem:[#allocation2 + $0xd] sm:$0xff]  ;;  %s1909_s18 = sld [smem:[#allocation3 + $0x18]] }
  0x66   : > { %v304_v11 = vld [vmem:[#allocation2 + $0x13] sm:$0xff]  ;;  %v273_v16 = vmul.f32 %v272_v10, %v1709_v6  ;;  %v264_v18 = vld [vmem:[#allocation2 + $0x1c] sm:$0xff]  ;;  %v1742_v26 = vld [vmem:[#allocation2 + $0x24] sm:$0xff]  ;;  %v332_v46 = vmul.f32 %v331_v43, %v1707_v4  ;;  %v337_v52 = vmul.f32 %v336_v48, %v1778_v44  ;;  %v342_v53 = vmul.f32 %v341_v49, %v1790_v47  ;;  %s1911_s20 = sld [smem:[#allocation3 + $0x1a]]  ;;  %s1926_s19 = sld [smem:[#allocation3 + $0x19]] }
  0x67   : > { %v1717_v12 = vld [vmem:[#allocation2 + $0x15] sm:$0xff]  ;;  %v1740_v25 = vld [vmem:[#allocation2 + $0x22] sm:$0xff]  ;;  %v268_v28 = vadd.f32 %v266_v15, %v261_v14  ;;  %v286_v30 = vmul.f32 %v285_v21, %v264_v18  ;;  %v307_v36 = vmul.f32 %v306_v23, %v304_v11  ;;  %v347_v54 = vstv %s1713_s30  ;;  %s1928_s24 = sld [smem:[#allocation3 + $0x1b]]  ;;  %s1945_s28 = sld [smem:[#allocation3 + $0x1c]] }
  0x68   : > { %v277_v20 = vld [vmem:[#allocation2 + $0x1a] sm:$0xff]  ;;  %v1753_v33 = vld [vmem:[#allocation2 + $0x25] sm:$0xff]  ;;  %v320_v42 = vmul.f32 %v319_v38, %v1740_v25  ;;  %v302_v56 = vadd.f32 %v300_v45, %v296_v35  ;;  %v348_v57 = vmul.f32 %v347_v54, %v1719_v13  ;;  %v2605_v58 = vstv %s1721_s6  ;;  %v1833_v15 = vld [vmem:[#allocation2 + $0x2e] sm:$0xff]  ;;  %s1947_s7 = sld [smem:[#allocation3 + $0x1e]]  ;;  %s1955_s8 = sld [smem:[#allocation3 + $0x1f]] }
  0x69   : > { %v1744_v27 = vld [vmem:[#allocation2 + $0x1b] sm:$0xff]  ;;  %v280_v29 = vmul.f32 %v279_v17, %v277_v20  ;;  %v382_v34 = vld [vmem:[#allocation2 + $0x23] sm:$0xff]  ;;  %v275_v39 = vadd.f32 %v273_v16, %v268_v28  ;;  %v2603_v59 = vstv %s1732_s26  ;;  %v339_v62 = vadd.f32 %v337_v52, %v332_v46  ;;  %2641 = vst [vmem:[#allocation18_spill] sm:$0xff] %v1833_v15  ;;  %s1957_s17 = sld [smem:[#allocation3 + $0x1d]]  ;;  %s2036_s3 = sld [smem:[#allocation3 + $0x27]] }
  0x6a   : > { %v311_v32 = vld [vmem:[#allocation2 + $0x1d] sm:$0xff]  ;;  %v354_v63 = vmul.f32 %v2605_v58, %v1794_v50  ;;  %v371_v0 = vmul.f32 %v2603_v59, %v1807_v55  ;;  %v309_v1 = vadd.f32 %v307_v36, %v302_v56  ;;  %v2604_v2 = vstv %s1755_s0  ;;  %s2654_s15 = sshll.u32 %s1659_s4, 6  ;;  %s2054_s23 = sld [smem:[#allocation3 + $0x29]] }
  0x6b   : > { %412 = vst.msk [vmem:[#allocation2 + $0x18] sm:$0xff] %vm197_vm0, %v1178_v7  ;;  %413 = vst.msk [vmem:[#allocation2 + $0x20] sm:$0xff] %vm197_vm0, %v1179_v8  ;;  %v314_v41 = vmul.f32 %v313_v37, %v311_v32  ;;  %v282_v51 = vadd.f32 %v280_v29, %v275_v39  ;;  %v2601_v5 = vstv %s1746_s5  ;;  %v267_v7 = vmul.f32 %v265_v3, %v264_v18  ;;  %v1206_v29 = vld [vmem:[%s1665_s27 + $0x20] sm:$0xff]  ;;  %v1207_v3 = vld [vmem:[%s1665_s27 + $0x28] sm:$0xff]  ;;  %s2044_s16 = scalar_lea.vmem [#allocation8], %s2654_s15  ;;  %s2060_s30 = sld [smem:[#allocation3 + $0x2c]] }
  0x6c   : > { %v344_v8 = vadd.f32 %v342_v53, %v339_v62  ;;  %v366_v9 = vmul.f32 %v2604_v2, %v1707_v4  ;;  %v378_v11 = vmul.f32 %v2601_v5, %v1814_v60  ;;  %v2600_v14 = vstv %s1766_s1  ;;  %s2083_s15 = sld [smem:[#allocation3 + $0x2e]]  ;;  %s2085_s14 = sld [smem:[#allocation3 + $0x2f]] }
  0x6d   : > { %v288_v61 = vadd.f32 %v286_v30, %v282_v51  ;;  %v2602_v18 = vstv %s1780_s13  ;;  %v316_v30 = vadd.f32 %v314_v41, %v309_v1  ;;  %v324_v32 = vstv %s1782_s25  ;;  %s2027_s25 = sld [smem:[#allocation3 + $0x24]]  ;;  %p2679_p12 = scmp.ne.s32.totalorder %s2629_s21, 0 }
  0x6e   : > { %v385_v35 = vmul.f32 %v2600_v14, %v382_v34  ;;  %v350_v51 = vadd.f32 %v348_v57, %v344_v8  ;;  %v358_v52 = vstv %s1796_s11  ;;  %v373_v53 = vadd.f32 %v371_v0, %v366_v9  ;;  %s2052_s11 = sld [smem:[#allocation3 + $0x28]] }
  0x6f   : > { %v291_v46 = vadd.f32 %v2602_v18, %v288_v61  ;;  %v322_v34 = vadd.f32 %v320_v42, %v316_v30  ;;  %v391_v1 = vstv %s1768_s29  ;;  %v2606_v14 = vstv %s1798_s10  ;;  %v1865_v61 = vld [vmem:[#allocation2 + $0x2a] sm:$0xff]  ;;  %s2006_s29 = sld [smem:[#allocation3 + $0x26]] }
  0x70   : > { %v269_v5 = vadd.f32 %v267_v7, %v1738_v24  ;;  %v356_v42 = vadd.f32 %v354_v63, %v350_v51  ;;  %v380_v30 = vadd.f32 %v378_v11, %v373_v53  ;;  %v392_v18 = vmul.f32 %v391_v1, %v1833_v15 }
  0x71   : > { %v293_v9 = vmax.f32 %v291_v46, 0.0  ;;  %v325_v2 = vadd.f32 %v324_v32, %v322_v34  ;;  %v274_v58 = vmul.f32 %v272_v10, %v1730_v19  ;;  %v281_v63 = vmul.f32 %v279_v17, %v1740_v25 }
  0x72   : > { %v1835_v16 = vld [vmem:[#allocation2 + $0x18] sm:$0xff]  ;;  %v1851_v45 = vld [vmem:[#allocation2 + $0x20] sm:$0xff]  ;;  %v287_v11 = vmul.f32 %v285_v21, %v1742_v26  ;;  %v359_v46 = vadd.f32 %v358_v52, %v356_v42  ;;  %v387_v51 = vadd.f32 %v385_v35, %v380_v30  ;;  %v297_v53 = vmul.f32 %v295_v31, %v1719_v13 }
  0x73   : > { %v1837_v20 = vld [vmem:[#allocation2 + $0x14] sm:$0xff]  ;;  %v1856_v56 = vld [vmem:[#allocation2 + $0x1c] sm:$0xff]  ;;  %v1869_v0 = vld [vmem:[#allocation2 + $0x24] sm:$0xff]  ;;  %v301_v10 = vmul.f32 %v299_v22, %v1709_v6  ;;  %v327_v17 = vmax.f32 %v325_v2, 0.0  ;;  %v276_v19 = vadd.f32 %v274_v58, %v269_v5  ;;  %v308_v21 = vmul.f32 %v306_v23, %v1744_v27 }
  0x74   : > { %v1839_v28 = vld [vmem:[#allocation2 + $0x16] sm:$0xff]  ;;  %v1858_v62 = vld [vmem:[#allocation2 + $0x1e] sm:$0xff]  ;;  %v315_v25 = vmul.f32 %v313_v37, %v1753_v33  ;;  %v361_v26 = vmax.f32 %v359_v46, 0.0  ;;  %v394_v31 = vadd.f32 %v392_v18, %v387_v51  ;;  %v321_v6 = vmul.f32 %v319_v38, %v1865_v61  ;;  %v1924_v58 = vld [vmem:[#allocation2 + $0xa] sm:$0xff] }
  0x75   : > { %v1847_v36 = vld [vmem:[#allocation2 + $0x13] sm:$0xff]  ;;  %v1867_v57 = vld [vmem:[#allocation2 + $0x22] sm:$0xff]  ;;  %v329_v23 = vadd.f32 %v327_v17, %v293_v9  ;;  %v283_v27 = vadd.f32 %v281_v63, %v276_v19  ;;  %v333_v33 = vmul.f32 %v331_v43, %v1719_v13  ;;  %v338_v37 = vmul.f32 %v336_v48, %v1790_v47 }
  0x76   : > { %v1849_v39 = vld [vmem:[#allocation2 + $0x15] sm:$0xff]  ;;  %v1876_v59 = vld [vmem:[#allocation2 + $0x1d] sm:$0xff]  ;;  %v1878_v24 = vld [vmem:[#allocation2 + $0x25] sm:$0xff]  ;;  %v397_v38 = vadd.f32 %v2606_v14, %v394_v31  ;;  %v343_v5 = vmul.f32 %v341_v49, %v1707_v4  ;;  %v349_v43 = vmul.f32 %v347_v54, %v1794_v50  ;;  %v2642_v34 = vstv %s1721_s6  ;;  %s2069_s6 = sld [smem:[#allocation3 + $0x2a]] }
  0x77   : > { %v1860_v41 = vld [vmem:[#allocation2 + $0x1a] sm:$0xff]  ;;  %v1880_v7 = vld [vmem:[#allocation2 + $0x23] sm:$0xff]  ;;  %v1916_v22 = vld [vmem:[#allocation2 + $0x30] sm:$0xff]  ;;  %v363_v48 = vadd.f32 %v361_v26, %v329_v23  ;;  %v289_v18 = vadd.f32 %v287_v11, %v283_v27  ;;  %v340_v35 = vadd.f32 %v338_v37, %v333_v33  ;;  %v2643_v30 = vstv %s1755_s0  ;;  %s1975_s0 = sld [smem:[#allocation3 + $0x20]] }
  0x78   : > { %v1871_v8 = vld [vmem:[#allocation2 + $0x1b] sm:$0xff]  ;;  %v355_v9 = vmul.f32 %v2642_v34, %v1916_v22  ;;  %v399_v49 = vmax.f32 %v397_v38, 0.0  ;;  %v367_v63 = vmul.f32 %v2643_v30, %v1719_v13  ;;  %v2644_v11 = vstv %s1732_s26  ;;  %v1234_v17 = vld [vmem:[%s1665_s27 + $0x30] sm:$0xff]  ;;  %s2071_s26 = sld [smem:[#allocation3 + $0x2b]] }
  0x79   : > { %618 = vst.msk [vmem:[#allocation2 + $0x18] sm:$0xff] %vm197_vm0, %v1206_v29  ;;  %619 = vst.msk [vmem:[#allocation2 + $0x20] sm:$0xff] %vm197_vm0, %v1207_v3  ;;  %v303_v29 = vadd.f32 %v301_v10, %v297_v53  ;;  %v1938_v3 = vld [vmem:[#allocation2 + $0x2b] sm:$0xff]  ;;  %v1943_v42 = vld [vmem:[#allocation2 + $0x36] sm:$0xff]  ;;  %v372_v46 = vmul.f32 %v2644_v11, %v1924_v58  ;;  %v345_v26 = vadd.f32 %v343_v5, %v340_v35  ;;  %v2646_v31 = vstv %s1746_s5  ;;  %s2017_s5 = sld [smem:[#allocation3 + $0x23]] }
  0x7a   : > { %v1235_v19 = vld [vmem:[%s1665_s27 + $0x38] sm:$0xff]  ;;  %v2647_v23 = vstv %s1766_s1  ;;  %s1994_s1 = sld [smem:[#allocation3 + $0x22]]  ;;  %s2034_s27 = sld [smem:[#allocation3 + $0x25]] }
  0x7b   : > { %v310_v2 = vadd.f32 %v308_v21, %v303_v29  ;;  %v2645_v21 = vstv %s1780_s13  ;;  %v379_v29 = vmul.f32 %v2646_v31, %v1717_v12  ;;  %v386_v27 = vmul.f32 %v2647_v23, %v1938_v3  ;;  %s1986_s13 = sld [smem:[#allocation3 + $0x21]] }
  0x7c   : > { %v374_v5 = vadd.f32 %v372_v46, %v367_v63  ;;  %v393_v12 = vmul.f32 %v391_v1, %v1943_v42 }
  0x7d   : > { %v317_v54 = vadd.f32 %v315_v25, %v310_v2  ;;  %v292_v25 = vadd.f32 %v2645_v21, %v289_v18  ;;  %v401_v2 = vadd.f32 %v399_v49, %v363_v48  ;;  %v351_v21 = vadd.f32 %v349_v43, %v345_v26 }
  0x7e   : > { %v2617_v48 = vstv %s1909_s18  ;;  %v381_v31 = vadd.f32 %v379_v29, %v374_v5  ;;  %v2615_v29 = vstv %s1926_s19 }
  0x7f   : > { %v323_v34 = vadd.f32 %v321_v6, %v317_v54  ;;  %v294_v11 = vmax.f32 %v292_v25, 0.0  ;;  %v2618_v6 = vstv %s1911_s20  ;;  %v403_v63 = vmul.f32 0.25, %v401_v2 }
  0x80   : > { %v1959_v51 = vld [vmem:[#allocation2 + $0x18] sm:$0xff]  ;;  %v1981_v38 = vld [vmem:[#allocation2 + $0x20] sm:$0xff]  ;;  %v466_v43 = vmul.f32 %v2618_v6, %v1835_v16  ;;  %v357_v14 = vadd.f32 %v355_v9, %v351_v21  ;;  %v2614_v2 = vstv %s1928_s24  ;;  %v388_v9 = vadd.f32 %v386_v27, %v381_v31 }
  0x81   : > { %v1961_v53 = vld [vmem:[#allocation2 + $0x14] sm:$0xff]  ;;  %v1988_v18 = vld [vmem:[#allocation2 + $0x1c] sm:$0xff]  ;;  %v2000_v1 = vld [vmem:[#allocation2 + $0x24] sm:$0xff]  ;;  %v326_v46 = vadd.f32 %v324_v32, %v323_v34  ;;  %v471_v32 = vmul.f32 %v2617_v48, %v1837_v20  ;;  %v405_v34 = vadd.f32 %v403_v63, %v1707_v4  ;;  %v478_v21 = vmul.f32 %v2615_v29, %v1839_v28 }
  0x82   : > { %v1963_v10 = vld [vmem:[#allocation2 + $0x16] sm:$0xff]  ;;  %v1990_v35 = vld [vmem:[#allocation2 + $0x1e] sm:$0xff]  ;;  %2650 = vst [vmem:[#allocation21_spill] sm:$0xff] %v2000_v1  ;;  %v360_v20 = vadd.f32 %v358_v52, %v357_v14  ;;  %v485_v4 = vmul.f32 %v2614_v2, %v1860_v41  ;;  %v395_v52 = vadd.f32 %v393_v12, %v388_v9  ;;  %v2616_v63 = vstv %s1957_s17 }
  0x83   : > { %v1977_v33 = vld [vmem:[#allocation2 + $0x13] sm:$0xff]  ;;  %2649 = vst [vmem:[#allocation20_spill] sm:$0xff] %v1990_v35  ;;  %v1998_v49 = vld [vmem:[#allocation2 + $0x22] sm:$0xff]  ;;  %v328_v5 = vmax.f32 %v326_v46, 0.0  ;;  %407 = vst.msk [vmem:[%s2044_s16] sm:$0xff] %vm197_vm0, %v405_v34  ;;  %v2612_v31 = vstv %s1975_s0 }
  0x84   : > { %v1979_v37 = vld [vmem:[#allocation2 + $0x15] sm:$0xff]  ;;  %v2011_v25 = vld [vmem:[#allocation2 + $0x1d] sm:$0xff]  ;;  %v2013_v26 = vld [vmem:[#allocation2 + $0x25] sm:$0xff]  ;;  %v362_v46 = vmax.f32 %v360_v20, 0.0  ;;  %v501_v12 = vmul.f32 %v2612_v31, %v1835_v16  ;;  %v546_v31 = vstv %s2034_s27  ;;  %s2208_s27 = sld [smem:[#allocation3 + $0x40]] }
  0x85   : > { %2648 = vst [vmem:[#allocation19_spill] sm:$0xff] %v1979_v37  ;;  %v1992_v30 = vld [vmem:[#allocation2 + $0x1a] sm:$0xff]  ;;  %2652 = vst [vmem:[#allocation23_spill] sm:$0xff] %v2013_v26  ;;  %v2015_v23 = vld [vmem:[#allocation2 + $0x23] sm:$0xff]  ;;  %v330_v14 = vadd.f32 %v328_v5, %v294_v11  ;;  %v2609_v5 = vstv %s1955_s8  ;;  %v547_v2 = vmul.f32 %v546_v31, %v1790_v47 }
  0x86   : > { %v2002_v54 = vld [vmem:[#allocation2 + $0x1b] sm:$0xff]  ;;  %2653 = vst [vmem:[#allocation24_spill] sm:$0xff] %v2015_v23  ;;  %v512_v20 = vmul.f32 %v2609_v5, %v1847_v36  ;;  %v536_v5 = vstv %s2006_s29  ;;  %s2195_s29 = sld [smem:[#allocation3 + $0x3c]] }
  0x87   : > { %2651 = vst [vmem:[#allocation22_spill] sm:$0xff] %v2002_v54  ;;  %824 = vst.msk [vmem:[#allocation2 + $0x18] sm:$0xff] %vm197_vm0, %v1234_v17  ;;  %v473_v17 = vadd.f32 %v471_v32, %v466_v43  ;;  %v2610_v43 = vstv %s1947_s7  ;;  %v2655_v32 = vstv %s1798_s10  ;;  %v364_v9 = vadd.f32 %v362_v46, %v330_v14  ;;  %s2077_s10 = sld [smem:[#allocation3 + $0x2d]] }
  0x88   : > { %825 = vst.msk [vmem:[#allocation2 + $0x20] sm:$0xff] %vm197_vm0, %v1235_v19  ;;  %v2613_v19 = vstv %s1945_s28  ;;  %v398_v34 = vadd.f32 %v2655_v32, %v395_v52  ;;  %v505_v11 = vmul.f32 %v2610_v43, %v1770_v40  ;;  %v524_v46 = vstv %s1994_s1  ;;  %s2184_s1 = sld [smem:[#allocation3 + $0x35]] }
  0x89   : > { %v491_v27 = vmul.f32 %v2613_v19, %v1856_v56  ;;  %v480_v41 = vadd.f32 %v478_v21, %v473_v17  ;;  %v2611_v17 = vstv %s1986_s13  ;;  %v525_v36 = vmul.f32 %v524_v46, %v1867_v57 }
  0x8a   : > { %v400_v52 = vmax.f32 %v398_v34, 0.0  ;;  %v507_v32 = vadd.f32 %v505_v11, %v501_v12  ;;  %v519_v14 = vmul.f32 %v2611_v17, %v1876_v59  ;;  %v537_v12 = vmul.f32 %v536_v5, %v1835_v16 }
  0x8b   : > { %v487_v21 = vadd.f32 %v485_v4, %v480_v41  ;;  %v541_v11 = vstv %s2027_s25  ;;  %v552_v19 = vstv %s2036_s3  ;;  %v582_v41 = vstv %s2071_s26  ;;  %s2197_s25 = sld [smem:[#allocation3 + $0x3e]]  ;;  %s2210_s3 = sld [smem:[#allocation3 + $0x3b]] }
  0x8c   : > { %v402_v34 = vadd.f32 %v400_v52, %v364_v9  ;;  %v514_v43 = vadd.f32 %v512_v20, %v507_v32  ;;  %v542_v17 = vmul.f32 %v541_v11, %v1778_v44  ;;  %v553_v9 = vmul.f32 %v552_v19, %v1851_v45  ;;  %s2247_s26 = sld [smem:[#allocation3 + $0x45]] }
  0x8d   : > { %v493_v4 = vadd.f32 %v491_v27, %v487_v21  ;;  %v558_v32 = vstv %s2052_s11  ;;  %v2658_v54 = vstv %s1909_s18  ;;  %s2151_s18 = sld [smem:[#allocation3 + $0x30]]  ;;  %s2216_s11 = sld [smem:[#allocation3 + $0x3f]] }
  0x8e   : > { %v404_v27 = vmul.f32 0.25, %v402_v34  ;;  %v521_v21 = vadd.f32 %v519_v14, %v514_v43  ;;  %v544_v52 = vadd.f32 %v542_v17, %v537_v12  ;;  %v559_v48 = vmul.f32 %v558_v32, %v1794_v50 }
  0x8f   : > { %v496_v59 = vadd.f32 %v2616_v63, %v493_v4  ;;  %v570_v34 = vstv %s2060_s30  ;;  %v575_v14 = vstv %s2069_s6  ;;  %v2656_v17 = vstv %s2017_s5  ;;  %s2230_s30 = sld [smem:[#allocation3 + $0x44]]  ;;  %s2240_s6 = sld [smem:[#allocation3 + $0x41]] }
  0x90   : > { %v406_v4 = vadd.f32 %v404_v27, %v1719_v13  ;;  %v527_v63 = vadd.f32 %v525_v36, %v521_v21  ;;  %v549_v6 = vadd.f32 %v547_v2, %v544_v52  ;;  %v571_v43 = vmul.f32 %v570_v34, %v1835_v16 }
  0x91   : > { %v498_v20 = vmax.f32 %v496_v59, 0.0  ;;  %v576_v13 = vmul.f32 %v575_v14, %v1807_v55  ;;  %v583_v36 = vmul.f32 %v582_v41, %v1814_v60  ;;  %v589_v59 = vstv %s2077_s10  ;;  %s2253_s10 = sld [smem:[#allocation3 + $0x46]] }
  0x92   : > { %408 = vst.msk [vmem:[%s2044_s16 + $0x8] sm:$0xff] %vm197_vm0, %v406_v4  ;;  %v530_v12 = vadd.f32 %v2656_v17, %v527_v63  ;;  %v555_v2 = vadd.f32 %v553_v9, %v549_v6  ;;  %v590_v27 = vmul.f32 %v589_v59, %v1880_v7  ;;  %v596_v21 = vstv %s2083_s15  ;;  %s2260_s15 = sld [smem:[#allocation3 + $0x47]] }
  0x93   : > { %v578_v4 = vadd.f32 %v576_v13, %v571_v43  ;;  %v597_v37 = vmul.f32 %v596_v21, %v1833_v15  ;;  %v2657_v63 = vstv %s1911_s20  ;;  %v472_v1 = vmul.f32 %v2658_v54, %v1856_v56  ;;  %s2136_s20 = sld [smem:[#allocation3 + $0x32]] }
  0x94   : > { %v532_v29 = vmax.f32 %v530_v12, 0.0  ;;  %v467_v17 = vmul.f32 %v2657_v63, %v1851_v45  ;;  %v561_v26 = vadd.f32 %v559_v48, %v555_v2  ;;  %v2659_v6 = vstv %s1926_s19  ;;  %s2153_s19 = sld [smem:[#allocation3 + $0x31]] }
  0x95   : > { %v479_v7 = vmul.f32 %v2659_v6, %v1858_v62  ;;  %v2660_v9 = vstv %s1928_s24  ;;  %v585_v12 = vadd.f32 %v583_v36, %v578_v4  ;;  %v2661_v43 = vstv %s1945_s28  ;;  %s2159_s24 = sld [smem:[#allocation3 + $0x33]]  ;;  %s2166_s28 = sld [smem:[#allocation3 + $0x34]] }
  0x96   : > { %v486_v52 = vmul.f32 %v2660_v9, %v1867_v57  ;;  %v534_v35 = vadd.f32 %v532_v29, %v498_v20  ;;  %v492_v13 = vmul.f32 %v2661_v43, %v1869_v0  ;;  %v2662_v15 = vstv %s1975_s0  ;;  %s2174_s0 = sld [smem:[#allocation3 + $0x38]] }
  0x97   : > { %v502_v23 = vmul.f32 %v2662_v15, %v1851_v45  ;;  %v2663_v48 = vstv %s2054_s23  ;;  %v474_v63 = vadd.f32 %v472_v1, %v467_v17  ;;  %v2664_v56 = vstv %s1947_s7  ;;  %s2169_s7 = sld [smem:[#allocation3 + $0x36]] }
  0x98   : > { %v564_v2 = vadd.f32 %v2663_v48, %v561_v26  ;;  %v506_v54 = vmul.f32 %v2664_v56, %v1839_v28  ;;  %v2665_v62 = vstv %s1955_s8  ;;  %v592_v57 = vadd.f32 %v590_v27, %v585_v12  ;;  %s2172_s8 = sld [smem:[#allocation3 + $0x37]] }
  0x99   : > { %v513_v6 = vmul.f32 %v2665_v62, %v1871_v8  ;;  %v2666_v29 = vstv %s1986_s13  ;;  %v526_v0 = vmul.f32 %v524_v46, %v1865_v61  ;;  %v538_v36 = vmul.f32 %v536_v5, %v1851_v45  ;;  %s2182_s13 = sld [smem:[#allocation3 + $0x39]] }
  0x9a   : > { %v520_v20 = vmul.f32 %v2666_v29, %v1878_v24  ;;  %v566_v15 = vmax.f32 %v564_v2, 0.0  ;;  %v481_v1 = vadd.f32 %v479_v7, %v474_v63  ;;  %v508_v26 = vadd.f32 %v506_v54, %v502_v23 }
  0x9b   : > { %v543_v28 = vmul.f32 %v541_v11, %v1790_v47  ;;  %v599_v4 = vadd.f32 %v597_v37, %v592_v57  ;;  %v548_v8 = vmul.f32 %v546_v31, %v1835_v16  ;;  %v554_v27 = vmul.f32 %v552_v19, %v1794_v50 }
  0x9c   : > { %v560_v24 = vmul.f32 %v558_v32, %v1916_v22  ;;  %v568_v5 = vadd.f32 %v566_v15, %v534_v35  ;;  %v488_v46 = vadd.f32 %v486_v52, %v481_v1  ;;  %v515_v17 = vadd.f32 %v513_v6, %v508_v26 }
  0x9d   : > { %v545_v9 = vadd.f32 %v543_v28, %v538_v36  ;;  %v2667_v12 = vstv %s2085_s14  ;;  %v572_v23 = vmul.f32 %v570_v34, %v1851_v45  ;;  %v577_v37 = vmul.f32 %v575_v14, %v1924_v58  ;;  %s2238_s14 = sld [smem:[#allocation3 + $0x43]] }
  0x9e   : > { %v602_v43 = vadd.f32 %v2667_v12, %v599_v4  ;;  %v584_v31 = vmul.f32 %v582_v41, %v1849_v39  ;;  %v494_v19 = vadd.f32 %v492_v13, %v488_v46  ;;  %v522_v11 = vadd.f32 %v520_v20, %v515_v17 }
  0x9f   : > { %v550_v32 = vadd.f32 %v548_v8, %v545_v9  ;;  %v591_v35 = vmul.f32 %v589_v59, %v1938_v3  ;;  %v579_v7 = vadd.f32 %v577_v37, %v572_v23  ;;  %v598_v34 = vmul.f32 %v596_v21, %v1943_v42 }
  0xa0   : > { %v604_v52 = vmax.f32 %v602_v43, 0.0  ;;  %v671_v39 = vstv %s2136_s20  ;;  %v2668_v41 = vstv %s1957_s17  ;;  %v528_v13 = vadd.f32 %v526_v0, %v522_v11  ;;  %s2190_s17 = sld [smem:[#allocation3 + $0x3a]]  ;;  %s2311_s20 = sld [smem:[#allocation3 + $0x48]] }
  0xa1   : > { %v497_v14 = vadd.f32 %v2668_v41, %v494_v19  ;;  %v556_v48 = vadd.f32 %v554_v27, %v550_v32  ;;  %v672_v59 = vmul.f32 %v671_v39, %v1959_v51  ;;  %v586_v63 = vadd.f32 %v584_v31, %v579_v7 }
  0xa2   : > { %v606_v2 = vadd.f32 %v604_v52, %v568_v5  ;;  %v676_v21 = vstv %s2151_s18  ;;  %v683_v56 = vstv %s2153_s19  ;;  %v2669_v62 = vstv %s2017_s5  ;;  %s2202_s5 = sld [smem:[#allocation3 + $0x3d]]  ;;  %s2313_s18 = sld [smem:[#allocation3 + $0x4a]] }
  0xa3   : > { %v499_v54 = vmax.f32 %v497_v14, 0.0  ;;  %v531_v6 = vadd.f32 %v2669_v62, %v528_v13  ;;  %v562_v57 = vadd.f32 %v560_v24, %v556_v48  ;;  %v677_v29 = vmul.f32 %v676_v21, %v1961_v53  ;;  %s2332_s19 = sld [smem:[#allocation3 + $0x49]] }
  0xa4   : > { %v608_v20 = vmul.f32 0.25, %v606_v2  ;;  %v593_v0 = vadd.f32 %v591_v35, %v586_v63  ;;  %v690_v36 = vstv %s2159_s24  ;;  %v2670_v1 = vstv %s2054_s23  ;;  %s2228_s23 = sld [smem:[#allocation3 + $0x42]]  ;;  %s2336_s24 = sld [smem:[#allocation3 + $0x4b]] }
  0xa5   : > { %v533_v15 = vmax.f32 %v531_v6, 0.0  ;;  %v565_v26 = vadd.f32 %v2670_v1, %v562_v57  ;;  %v679_v28 = vadd.f32 %v677_v29, %v672_v59  ;;  %v684_v53 = vmul.f32 %v683_v56, %v1963_v10 }
  0xa6   : > { %v610_v4 = vadd.f32 %v608_v20, %v1835_v16  ;;  %v600_v8 = vadd.f32 %v598_v34, %v593_v0  ;;  %v691_v27 = vmul.f32 %v690_v36, %v1992_v30  ;;  %v696_v24 = vstv %s2166_s28  ;;  %s2346_s28 = sld [smem:[#allocation3 + $0x4c]] }
  0xa7   : > { %v535_v5 = vadd.f32 %v533_v15, %v499_v54  ;;  %v567_v46 = vmax.f32 %v565_v26, 0.0  ;;  %v686_v17 = vadd.f32 %v684_v53, %v679_v28  ;;  %v697_v16 = vmul.f32 %v696_v24, %v1988_v18 }
  0xa8   : > { %1204 = vst.msk [vmem:[%s2044_s16 + $0x10] sm:$0xff] %vm197_vm0, %v610_v4  ;;  %v2671_v9 = vmov %v2667_v12  ;;  %v706_v43 = vstv %s2174_s0  ;;  %v710_v30 = vstv %s2169_s7  ;;  %v717_v23 = vstv %s2172_s8  ;;  %s2348_s7 = sld [smem:[#allocation3 + $0x4d]]  ;;  %s2353_s8 = sld [smem:[#allocation3 + $0x50]] }
  0xa9   : > { %v603_v12 = vadd.f32 %v2671_v9, %v600_v8  ;;  %v569_v37 = vadd.f32 %v567_v46, %v535_v5  ;;  %v693_v31 = vadd.f32 %v691_v27, %v686_v17  ;;  %v707_v19 = vmul.f32 %v706_v43, %v1959_v51  ;;  %s2357_s0 = sld [smem:[#allocation3 + $0x4e]] }
  0xaa   : > { %v711_v11 = vmul.f32 %v710_v30, %v1770_v40  ;;  %v701_v35 = vstv %s2184_s1  ;;  %v718_v52 = vmul.f32 %v717_v23, %v1977_v33  ;;  %v724_v7 = vstv %s2182_s13  ;;  %s2361_s13 = sld [smem:[#allocation3 + $0x4f]]  ;;  %s2375_s1 = sld [smem:[#allocation3 + $0x56]] }
  0xab   : > { %v605_v32 = vmax.f32 %v603_v12, 0.0  ;;  %v699_v34 = vadd.f32 %v697_v16, %v693_v31  ;;  %v725_v14 = vmul.f32 %v724_v7, %v2011_v25  ;;  %v730_v13 = vstv %s2190_s17  ;;  %s2363_s17 = sld [smem:[#allocation3 + $0x51]] }
  0xac   : > { %v713_v41 = vadd.f32 %v711_v11, %v707_v19  ;;  %v731_v59 = vmul.f32 %v730_v13, %v1998_v49  ;;  %v742_v33 = vstv %s2197_s25  ;;  %v747_v2 = vstv %s2195_s29  ;;  %s2378_s29 = sld [smem:[#allocation3 + $0x52]]  ;;  %s2380_s25 = sld [smem:[#allocation3 + $0x54]] }
  0xad   : > { %v607_v48 = vadd.f32 %v605_v32, %v569_v37  ;;  %v702_v63 = vadd.f32 %v701_v35, %v699_v34  ;;  %v743_v62 = vmul.f32 %v742_v33, %v1959_v51  ;;  %v748_v25 = vmul.f32 %v747_v2, %v1778_v44  ;;  %v2672_v32 = vld [vmem:[#allocation24_spill] sm:$0xff] }
  0xae   : > { %v720_v54 = vadd.f32 %v718_v52, %v713_v41  ;;  %v735_v57 = vstv %s2210_s3  ;;  %v752_v29 = vstv %s2202_s5  ;;  %v764_v20 = vstv %s2208_s27  ;;  %s2389_s5 = sld [smem:[#allocation3 + $0x55]]  ;;  %s2391_s27 = sld [smem:[#allocation3 + $0x53]] }
  0xaf   : > { %v609_v6 = vmul.f32 0.25, %v607_v48  ;;  %v750_v15 = vadd.f32 %v748_v25, %v743_v62  ;;  %v753_v1 = vmul.f32 %v752_v29, %v1790_v47  ;;  %v758_v26 = vstv %s2216_s11  ;;  %v2674_v62 = vld [vmem:[#allocation20_spill] sm:$0xff]  ;;  %s2395_s3 = sld [smem:[#allocation3 + $0x57]]  ;;  %s2401_s11 = sld [smem:[#allocation3 + $0x58]] }
  0xb0   : > { %v727_v0 = vadd.f32 %v725_v14, %v720_v54  ;;  %v704_v53 = vmax.f32 %v702_v63, 0.0  ;;  %v759_v44 = vmul.f32 %v758_v26, %v1981_v38  ;;  %v765_v4 = vmul.f32 %v764_v20, %v1794_v50 }
  0xb1   : > { %v611_v28 = vadd.f32 %v609_v6, %v1851_v45  ;;  %v755_v27 = vadd.f32 %v753_v1, %v750_v15  ;;  %v776_v5 = vstv %s2230_s30  ;;  %v781_v46 = vstv %s2228_s23  ;;  %s2408_s23 = sld [smem:[#allocation3 + $0x5c]]  ;;  %s2414_s30 = sld [smem:[#allocation3 + $0x5a]] }
  0xb2   : > { %v733_v8 = vadd.f32 %v731_v59, %v727_v0  ;;  %v769_v17 = vstv %s2240_s6  ;;  %v777_v45 = vmul.f32 %v776_v5, %v1959_v51  ;;  %v782_v16 = vmul.f32 %v781_v46, %v1807_v55  ;;  %s2423_s6 = sld [smem:[#allocation3 + $0x59]] }
  0xb3   : > { %1205 = vst.msk [vmem:[%s2044_s16 + $0x18] sm:$0xff] %vm197_vm0, %v611_v28  ;;  %v788_v9 = vstv %s2238_s14  ;;  %v761_v37 = vadd.f32 %v759_v44, %v755_v27  ;;  %v795_v19 = vstv %s2247_s26  ;;  %v802_v34 = vstv %s2253_s10  ;;  %s2416_s14 = sld [smem:[#allocation3 + $0x5b]]  ;;  %s2427_s26 = sld [smem:[#allocation3 + $0x5d]] }
  0xb4   : > { %v736_v12 = vadd.f32 %v735_v57, %v733_v8  ;;  %v789_v31 = vmul.f32 %v788_v9, %v1814_v60  ;;  %v784_v11 = vadd.f32 %v782_v16, %v777_v45  ;;  %v796_v52 = vmul.f32 %v795_v19, %v2672_v32  ;;  %v2673_v60 = vld [vmem:[#allocation18_spill] sm:$0xff]  ;;  %s2429_s10 = sld [smem:[#allocation3 + $0x5e]] }
  0xb5   : > { %v673_v41 = vmul.f32 %v671_v39, %v1981_v38  ;;  %v767_v14 = vadd.f32 %v765_v4, %v761_v37  ;;  %v807_v48 = vstv %s2260_s15  ;;  %v678_v59 = vmul.f32 %v676_v21, %v1988_v18  ;;  %v2675_v21 = vld [vmem:[#allocation21_spill] sm:$0xff]  ;;  %v2677_v4 = vld [vmem:[#allocation23_spill] sm:$0xff]  ;;  %s2444_s15 = sld [smem:[#allocation3 + $0x5f]] }
  0xb6   : > { %v738_v55 = vmax.f32 %v736_v12, 0.0  ;;  %v791_v63 = vadd.f32 %v789_v31, %v784_v11  ;;  %v803_v54 = vmul.f32 %v802_v34, %v2673_v60  ;;  %v685_v25 = vmul.f32 %v683_v56, %v2674_v62 }
  0xb7   : > { %v692_v39 = vmul.f32 %v690_v36, %v1998_v49  ;;  %v770_v0 = vadd.f32 %v769_v17, %v767_v14  ;;  %v680_v15 = vadd.f32 %v678_v59, %v673_v41  ;;  %v708_v1 = vmul.f32 %v706_v43, %v1981_v38  ;;  %v2676_v49 = vld [vmem:[#allocation22_spill] sm:$0xff] }
  0xb8   : > { %v740_v6 = vadd.f32 %v738_v55, %v704_v53  ;;  %v798_v18 = vadd.f32 %v796_v52, %v791_v63  ;;  %v698_v28 = vmul.f32 %v696_v24, %v2675_v21  ;;  %v712_v56 = vmul.f32 %v710_v30, %v1963_v10  ;;  %v2368_v63 = vld [vmem:[#allocation2 + $0x16] sm:$0xff] }
  0xb9   : > { %v719_v36 = vmul.f32 %v717_v23, %v2676_v49  ;;  %v772_v53 = vmax.f32 %v770_v0, 0.0  ;;  %v687_v44 = vadd.f32 %v685_v25, %v680_v15  ;;  %v726_v43 = vmul.f32 %v724_v7, %v2677_v4  ;;  %v894_v25 = vld [vmem:[#allocation2 + $0x1a] sm:$0xff] }
  0xba   : > { %v744_v8 = vmul.f32 %v742_v33, %v1981_v38  ;;  %v805_v27 = vadd.f32 %v803_v54, %v798_v18  ;;  %v714_v45 = vadd.f32 %v712_v56, %v708_v1  ;;  %v732_v24 = vmul.f32 %v730_v13, %v1865_v61 }
  0xbb   : > { %v749_v16 = vmul.f32 %v747_v2, %v1790_v47  ;;  %v774_v10 = vadd.f32 %v772_v53, %v740_v6  ;;  %v694_v30 = vadd.f32 %v692_v39, %v687_v44  ;;  %v754_v23 = vmul.f32 %v752_v29, %v1959_v51  ;;  %v2678_v2 = vld [vmem:[#allocation19_spill] sm:$0xff] }
  0xbc   : > { %v760_v12 = vmul.f32 %v758_v26, %v1794_v50  ;;  %v808_v7 = vadd.f32 %v807_v48, %v805_v27  ;;  %v721_v33 = vadd.f32 %v719_v36, %v714_v45  ;;  %v778_v31 = vmul.f32 %v776_v5, %v1981_v38  ;;  %v2350_v50 = vld [vmem:[#allocation2 + $0x18] sm:$0xff] }
  0xbd   : > { %v751_v37 = vadd.f32 %v749_v16, %v744_v8  ;;  %v700_v61 = vadd.f32 %v698_v28, %v694_v30  ;;  %v766_v47 = vmul.f32 %v764_v20, %v1916_v22  ;;  %v783_v13 = vmul.f32 %v781_v46, %v1924_v58  ;;  %v880_v20 = vld [vmem:[#allocation2 + $0x14] sm:$0xff] }
  0xbe   : > { %v790_v29 = vmul.f32 %v788_v9, %v2678_v2  ;;  %v810_v26 = vmax.f32 %v808_v7, 0.0  ;;  %v728_v11 = vadd.f32 %v726_v43, %v721_v33  ;;  %v797_v32 = vmul.f32 %v795_v19, %v1938_v3  ;;  %v921_v30 = vld [vmem:[#allocation2 + $0x13] sm:$0xff] }
  0xbf   : > { %v756_v5 = vadd.f32 %v754_v23, %v751_v37  ;;  %v703_v46 = vadd.f32 %v701_v35, %v700_v61  ;;  %v785_v52 = vadd.f32 %v783_v13, %v778_v31  ;;  %v877_v9 = vstv %s2313_s18  ;;  %v928_v23 = vld [vmem:[#allocation2 + $0x1d] sm:$0xff]  ;;  %s1268_s18 = sshll.u32 %s1477_s12, 10  ;;  %s1492_s12 = smov [#allocation8]  }
  0xc0   : > { %v882_v41 = vstv %s2311_s20  ;;  %v812_v55 = vadd.f32 %v810_v26, %v774_v10  ;;  %v734_v14 = vadd.f32 %v732_v24, %v728_v11  ;;  %v878_v19 = vmul.f32 %v877_v9, %v2350_v50  ;;  %s1044_s20 = sshll.u32 %s2044_s16, 4  ;;  %s2531_s20 = int_to_ptr.vmem [resolvable:$true] %s1044_s20 }
  0xc1   : > { %v762_v59 = vadd.f32 %v760_v12, %v756_v5  ;;  %v705_v35 = vmax.f32 %v703_v46, 0.0  ;;  %v792_v60 = vadd.f32 %v790_v29, %v785_v52  ;;  %v804_v54 = vmul.f32 %v802_v34, %v1943_v42  ;;  %v881_v34 = vld [vmem:[#allocation2 + $0x1c] sm:$0xff] }
  0xc2   : > { %v883_v62 = vmul.f32 %v882_v41, %v880_v20  ;;  %v814_v39 = vmul.f32 0.25, %v812_v55  ;;  %v737_v6 = vadd.f32 %v735_v57, %v734_v14  ;;  %v889_v15 = vstv %s2332_s19  ;;  %v2446_v20 = vld [vmem:[#allocation2 + $0x20] sm:$0xff] }
  0xc3   : > { %v768_v0 = vadd.f32 %v766_v47, %v762_v59  ;;  %v799_v1 = vadd.f32 %v797_v32, %v792_v60  ;;  %v890_v21 = vmul.f32 %v889_v15, %v2368_v63  ;;  %v896_v28 = vstv %s2336_s24  ;;  %v2431_v47 = vld [vmem:[#allocation2 + $0x22] sm:$0xff] }
  0xc4   : > { %v885_v18 = vadd.f32 %v883_v62, %v878_v19  ;;  %v816_v57 = vadd.f32 %v814_v39, %v1959_v51  ;;  %v739_v56 = vmax.f32 %v737_v6, 0.0  ;;  %v897_v36 = vmul.f32 %v896_v28, %v894_v25  ;;  %v1347_v19 = vld [vmem:[#allocation2 + $0x8] sm:$0xff]  ;;  %v1348_v25 = vld [vmem:[#allocation2 + $0x10] sm:$0xff] }
  0xc5   : > { %v771_v49 = vadd.f32 %v769_v17, %v768_v0  ;;  %v806_v53 = vadd.f32 %v804_v54, %v799_v1  ;;  %v902_v4 = vstv %s2346_s28  ;;  %v907_v43 = vstv %s2348_s7  ;;  %s2536_s28 = scalar_lea.hbm %s2590_s2, %s1268_s18  ;;  %s1028_s7 = scalar_lea.sflag [#allocation5], %s1659_s4 }
  0xc6   : > { %v892_v44 = vadd.f32 %v890_v21, %v885_v18  ;;  %1232 = vst.msk [vmem:[%s2044_s16 + $0x20] sm:$0xff] %vm197_vm0, %v816_v57  ;;  %v741_v51 = vadd.f32 %v739_v56, %v705_v35  ;;  %v903_v8 = vmul.f32 %v902_v4, %v881_v34  ;;  %v912_v27 = vstv %s2353_s8  ;;  %s1399_s8 = scalar_lea.vmem %s2531_s20, 1024 }
  0xc7   : > { %v773_v17 = vmax.f32 %v771_v49, 0.0  ;;  %v809_v45 = vadd.f32 %v807_v48, %v806_v53  ;;  %v913_v16 = vmul.f32 %v912_v27, %v2350_v50  ;;  %v916_v10 = vstv %s2357_s0  ;;  %p1400_p7 = scmp.ne.s32.totalorder %s2531_s20, %s1399_s8  ;;  %s1403_s0 = sshll.u32 %s1492_s12, 4  ;;  %s1404_s0 = int_to_ptr.vmem [resolvable:$false] %s1403_s0 }
  0xc8   : > { %v899_v24 = vadd.f32 %v897_v36, %v892_v44  ;;  %v917_v48 = vmul.f32 %v916_v10, %v1770_v40  ;;  %v923_v7 = vstv %s2361_s13  ;;  %v930_v33 = vstv %s2363_s17  ;;  %v999_v36 = vld [vmem:[#allocation2 + $0x23] sm:$0xff]  ;;  %s1405_s13 = scalar_lea.vmem %s1404_s0, 2048  ;;  %p1406_p0 = scmp.lt.s32.totalorder %s2531_s20, %s1404_s0 }
  0xc9   : > { %v775_v12 = vadd.f32 %v773_v17, %v741_v51  ;;  %v811_v37 = vmax.f32 %v809_v45, 0.0  ;;  %v2425_v31 = vmul.f32 %v882_v41, %v881_v34  ;;  %v924_v13 = vmul.f32 %v923_v7, %v921_v30  ;;  %v1350_v17 = vld [vmem:[#allocation2 + $0x2] sm:$0xff]  ;;  %p1401_p2 = pnand %p1400_p7, %p2679_p12  ;;  %p1407_p1 = scmp.lt.s32.totalorder %s1405_s13, %s1399_s8 }
  0xca   : > { %v905_v61 = vadd.f32 %v903_v8, %v899_v24  ;;  %v919_v40 = vadd.f32 %v917_v48, %v913_v16  ;;  %v931_v2 = vmul.f32 %v930_v33, %v928_v23  ;;  %v948_v29 = vstv %s2375_s1  ;;  %v888_v45 = vld [vmem:[#allocation2 + $0x1e] sm:$0xff]  ;;  %v1351_v16 = vld [vmem:[#allocation2 + $0xd] sm:$0xff] }
  0xcb   : > { %v813_v26 = vadd.f32 %v811_v37, %v775_v12  ;;  %v936_v5 = vstv %s2378_s29  ;;  %v949_v32 = vmul.f32 %v948_v29, %v2350_v50  ;;  %v941_v52 = vstv %s2391_s27  ;;  %p1402_p6 = pneg %p1401_p2  ;;  %p1408_p9 = por %p1407_p1, %p1406_p0 }
  0xcc   : > { %v908_v11 = vadd.f32 %v907_v43, %v905_v61  ;;  %v926_v46 = vadd.f32 %v924_v13, %v919_v40  ;;  %v953_v41 = vstv %s2380_s25  ;;  %v958_v55 = vstv %s2389_s5  ;;  %v901_v13 = vld [vmem:[#allocation2 + $0x24] sm:$0xff] }
  0xcd   : > { %v815_v14 = vmul.f32 0.25, %v813_v26  ;;  %v937_v59 = vmul.f32 %v936_v5, %v2431_v47  ;;  %v954_v35 = vmul.f32 %v1347_v19, %v953_v41  ;;  %v964_v60 = vstv %s2395_s3  ;;  %v1352_v26 = vld [vmem:[#allocation2 + $0x2e] sm:$0xff]  ;;  %p1409_p8 = pnand %p1408_p9, %p1402_p6 }
  0xce   : > { %v910_v54 = vmax.f32 %v908_v11, 0.0  ;;  %v933_v62 = vadd.f32 %v931_v2, %v926_v46  ;;  %v959_v39 = vmul.f32 %v1348_v25, %v958_v55  ;;  %v970_v6 = vstv %s2401_s11 }
  0xcf   : > { %v817_v0 = vadd.f32 %v815_v14, %v1981_v38  ;;  %v956_v1 = vadd.f32 %v954_v35, %v949_v32  ;;  %v965_v34 = vmul.f32 %v964_v60, %v2446_v20  ;;  %v982_v18 = vstv %s2408_s23  ;;  %v1349_v38 = vld [vmem:[#allocation2 + $0x28] sm:$0xff]  ;;  %v922_v14 = vld [vmem:[#allocation2 + $0x1b] sm:$0xff] }
  0xd0   : > { %v939_v21 = vadd.f32 %v937_v59, %v933_v62  ;;  %v983_v57 = vmul.f32 %v982_v18, %v2350_v50  ;;  %v987_v56 = vstv %s2414_s30  ;;  %v994_v49 = vstv %s2416_s14  ;;  %v929_v62 = vld [vmem:[#allocation2 + $0x25] sm:$0xff] }
  0xd1   : > { %1233 = vst.msk [vmem:[%s2044_s16 + $0x28] sm:$0xff] %vm197_vm0, %v817_v0  ;;  %v961_v53 = vadd.f32 %v959_v39, %v956_v1  ;;  %v971_v44 = vmul.f32 %v1349_v38, %v970_v6  ;;  %v975_v51 = vstv %s2423_s6  ;;  %v988_v8 = vmul.f32 %v1350_v17, %v987_v56 }
  0xd2   : > { %v942_v24 = vadd.f32 %v941_v52, %v939_v21  ;;  %v995_v30 = vmul.f32 %v1351_v16, %v994_v49  ;;  %v1001_v23 = vstv %s2427_s26  ;;  %v1008_v12 = vstv %s2429_s10 }
  0xd3   : > { %v967_v48 = vadd.f32 %v965_v34, %v961_v53  ;;  %v990_v37 = vadd.f32 %v988_v8, %v983_v57  ;;  %v1002_v61 = vmul.f32 %v1001_v23, %v999_v36  ;;  %v879_v40 = vmul.f32 %v877_v9, %v2446_v20  ;;  %v993_v8 = vld [vmem:[#allocation2 + $0x15] sm:$0xff] }
  0xd4   : > { %v944_v2 = vmax.f32 %v942_v24, 0.0  ;;  %v1009_v11 = vmul.f32 %v1352_v26, %v1008_v12  ;;  %v1013_v32 = vstv %s2444_s15  ;;  %v891_v46 = vmul.f32 %v889_v15, %v888_v45 }
  0xd5   : > { %v973_v59 = vadd.f32 %v971_v44, %v967_v48  ;;  %v997_v19 = vadd.f32 %v995_v30, %v990_v37  ;;  %v886_v35 = vadd.f32 %v2425_v31, %v879_v40  ;;  %v914_v9 = vmul.f32 %v912_v27, %v2446_v20 }
  0xd6   : > { %v946_v39 = vadd.f32 %v944_v2, %v910_v54  ;;  %v898_v0 = vmul.f32 %v896_v28, %v2431_v47  ;;  %v904_v1 = vmul.f32 %v902_v4, %v901_v13  ;;  %v918_v15 = vmul.f32 %v916_v10, %v2368_v63  ;;  %v1353_v63 = vld [vmem:[#allocation2 + $0x2a] sm:$0xff] }
  0xd7   : > { %v976_v34 = vadd.f32 %v975_v51, %v973_v59  ;;  %v1004_v21 = vadd.f32 %v1002_v61, %v997_v19  ;;  %v893_v57 = vadd.f32 %v891_v46, %v886_v35  ;;  %v925_v31 = vmul.f32 %v923_v7, %v922_v14 }
  0xd8   : > { %v920_v36 = vadd.f32 %v918_v15, %v914_v9  ;;  %v932_v27 = vmul.f32 %v930_v33, %v929_v62  ;;  %v950_v54 = vmul.f32 %v948_v29, %v2446_v20  ;;  %v955_v53 = vmul.f32 %v1348_v25, %v953_v41 }
  0xd9   : > { %v978_v28 = vmax.f32 %v976_v34, 0.0  ;;  %v1011_v4 = vadd.f32 %v1009_v11, %v1004_v21  ;;  %v900_v47 = vadd.f32 %v898_v0, %v893_v57  ;;  %v938_v10 = vmul.f32 %v1353_v63, %v936_v5 }
  0xda   : > { %v927_v44 = vadd.f32 %v925_v31, %v920_v36  ;;  %v957_v17 = vadd.f32 %v955_v53, %v950_v54  ;;  %v960_v7 = vmul.f32 %v958_v55, %v2350_v50  ;;  %v984_v33 = vmul.f32 %v982_v18, %v2446_v20 }
  0xdb   : > { %v980_v29 = vadd.f32 %v978_v28, %v946_v39  ;;  %v1014_v41 = vadd.f32 %v1013_v32, %v1011_v4  ;;  %v906_v25 = vadd.f32 %v904_v1, %v900_v47  ;;  %v989_v45 = vmul.f32 %v987_v56, %v1924_v58 }
  0xdc   : > { %v934_v24 = vadd.f32 %v932_v27, %v927_v44  ;;  %v962_v16 = vadd.f32 %v960_v7, %v957_v17  ;;  %v966_v30 = vmul.f32 %v1349_v38, %v964_v60  ;;  %v972_v5 = vmul.f32 %v970_v6, %v1916_v22 }
  0xdd   : > { %v1016_v48 = vmax.f32 %v1014_v41, 0.0  ;;  %v909_v55 = vadd.f32 %v907_v43, %v906_v25  ;;  %v991_v37 = vadd.f32 %v989_v45, %v984_v33  ;;  %v996_v18 = vmul.f32 %v994_v49, %v993_v8 }
  0xde   : > { %v940_v61 = vadd.f32 %v938_v10, %v934_v24  ;;  %v968_v40 = vadd.f32 %v966_v30, %v962_v16  ;;  %v1003_v56 = vmul.f32 %v1001_v23, %v1938_v3  ;;  %v1010_v2 = vmul.f32 %v1008_v12, %v1943_v42 }
  0xdf   : > { %v1018_v13 = vadd.f32 %v1016_v48, %v980_v29  ;;  %v998_v58 = vadd.f32 %v996_v18, %v991_v37  ;;  %v911_v60 = vmax.f32 %v909_v55, 0.0 }
  0xe0   : > { %v943_v22 = vadd.f32 %v941_v52, %v940_v61  ;;  %v974_v6 = vadd.f32 %v972_v5, %v968_v40 }
  0xe1   : > { %v1020_v38 = vmul.f32 0.25, %v1018_v13  ;;  %v1005_v43 = vadd.f32 %v1003_v56, %v998_v58 }
  0xe2   : > { %v945_v26 = vmax.f32 %v943_v22, 0.0  ;;  %v977_v49 = vadd.f32 %v975_v51, %v974_v6 }
  0xe3   : > { %v1022_v11 = vadd.f32 %v1020_v38, %v2350_v50  ;;  %v1012_v46 = vadd.f32 %v1010_v2, %v1005_v43 }
  0xe4   : > { %v947_v14 = vadd.f32 %v945_v26, %v911_v60  ;;  %v979_v3 = vmax.f32 %v977_v49, 0.0 }
  0xe5   : > { %1260 = vst.msk [vmem:[%s2044_s16 + $0x30] sm:$0xff] %vm197_vm0, %v1022_v11  ;;  %v1015_v42 = vadd.f32 %v1013_v32, %v1012_v46 }
  0xe6   : > { %v981_v23 = vadd.f32 %v979_v3, %v947_v14 }
  0xe7   : > { %v1017_v52 = vmax.f32 %v1015_v42, 0.0 }
  0xe9   : > { %v1019_v12 = vadd.f32 %v1017_v52, %v981_v23 }
  0xeb   : > { %v1021_v51 = vmul.f32 0.25, %v1019_v12 }
  0xed   : > { %v1023_v50 = vadd.f32 %v1021_v51, %v2446_v20 }
  0xef   : > { %1261 = vst.msk [vmem:[%s2044_s16 + $0x38] sm:$0xff] %vm197_vm0, %v1023_v50 }
  0xf0   : > { %1412 = shalt.err (!%p1409_p8)
}
  0xf1   : > { %s1413_s16 = scalar_lea.hbm %s2536_s28, 1024  ;;  %s1417_s29 = scalar_lea.hbm %s2590_s2, 2048 }
  0xf2   : > { %p1414_p4 = scmp.ne.s32.totalorder %s2536_s28, %s1413_s16  ;;  %p1418_p5 = scmp.lt.u32.totalorder %s2536_s28, %s2590_s2 }
  0xf3   : > { %p1419_p13 = scmp.lt.u32.totalorder %s1417_s29, %s1413_s16  ;;  %p1421_p7 = scmp.lt.u32.totalorder %s1413_s16, %s2536_s28 }
  0xf4   : > { %p1415_p10 = pnand %p1414_p4, %p2679_p12 }
  0xf5   : > { %p1420_p3 = por %p1419_p13, %p1418_p5 }
  0xf6   : > { %p1416_p11 = pneg %p1415_p10 }
  0xf7   : > { %p1422_p2 = por %p1421_p7, %p1420_p3 }
  0xf9   : > { %p1423_p6 = pnand %p1422_p2, %p1416_p11 }
  0xfb   : > { %1426 = shalt.err (!%p1423_p6)
}
  0xfc   : > { %s1493_s27 = smov 128   ;;  %s1494_s3 = smov 8  }
  0xfd   : > { %1275 = dma.vmem_to_hbm [thread:$0]  (%p2679_p12), %s2531_s20, 1024, %s2536_s28, %s1028_s7, %s1493_s27, %s1493_s27, %s1494_s3  }
  0xfe PF: > { %s2680_s11 = sld [smem:[#allocation15_spill]]  ;;  %s1059_s23 = sand.u32 1, %s1465_s9  }
  0xff   : > { %p2681_p0 = scmp.ne.s32.totalorder %s2630_s22, 0  ;;  %s1060_s30 = scalar_lea.sflag [#allocation5], %s1059_s23 }
 0x104   : > { %p2682_p1 = scmp.ge.s32.totalorder %s2680_s11, 2 }
 0x106   : > { %p1286_p9 = pnand %p2682_p1, %p2681_p0 }
 0x108   : > { %1460 = dma.done.wait (!%p1286_p9), %s1060_s30, 1024  }
 0x109   : > { %1462 = vsyncadd (!%p1286_p9), %s1060_s30, 4294966272  ;;  %s19_s14 = sadd.s32 1, %s2680_s11   ;;  %s2683_s9 = sld [smem:[#allocation12_spill]] }
 0x10a   : > { %p16_p8 = scmp.ge.s32.totalorder %s19_s14, 4   ;;  %s2684_s10 = sld [smem:[#allocation13_spill]] }
 0x10b   : > { %s2685_s11 = sld [smem:[#allocation17_spill]]  ;;  %s2686_s12 = sld [smem:[#allocation14_spill]] }
 0x10c   : > { %s2687_s13 = sld [smem:[#allocation16_spill]]  ;;  %18 = sbr.rel (!%p16_p8) target bundleno = 10 (0xa), region = 84 }
 0x113   :  { %1065 = vsyncpa [#allocation4], 1 }
 0x114   :  { %1067 = vsyncpa [#allocation4 + $0x1], 1 }
 0x115   :  { %1068 = vsyncpa [#allocation5], 1 }
 0x116   :  { %1070 = vsyncpa [#allocation5 + $0x1], 1 }
 0x117   :  { %1071 = vsyncpa [#allocation6], 1 }
 0x118   :  { %1073 = vsyncpa [#allocation6 + $0x1], 1 }

</bundles_post_ra>
